<compile_context>
chip_gen: v5e
topology: v5e:2x2
jax: 0.10.0
libtpu: 0.0.40
codegen_flags: <defaults>
</compile_context>

<pallas_src>
import math

import numpy as np

import jax
import jax.numpy as jnp
from jax.experimental import pallas as pl
from jax.experimental.pallas import tpu as pltpu


def _round_up(x, m):
    return (x + m - 1) // m * m


def make_gcn_kernel(h_resident, tk):
    """Build the kernel body. Closure args:
    h_resident: True  -> h_ref is the full (Np, Fi) feature matrix (VMEM resident)
                False -> h_ref is the (tk, Fi) neighbor tile selected by index_map
    tk        : neighbor-tile size (static int, multiple of 128)
    """

    def kernel(ktile_ids_ref, kcount_ref,          # scalar-prefetch (SMEM)
               adj_ref, h_ref, inv_deg_ref, wt_ref, b_ref,   # inputs
               out_ref,                                       # output
               acc_ref):                                      # VMEM scratch
        i = pl.program_id(0)
        j = pl.program_id(1)

        @pl.when(j == 0)
        def _():
            acc_ref[...] = jnp.zeros_like(acc_ref)

        # Only accumulate for the (data-dependent) number of nonzero adjacency
        # tiles of this row tile; padded steps repeat the previous block index
        # so their DMA is skipped and the dot is gated off here.
        @pl.when(j < kcount_ref[i])
        def _():
            if h_resident:
                kt = ktile_ids_ref[i, j]
                start = pl.multiple_of(kt * tk, tk)
                hk = h_ref[pl.ds(start, tk), :]
            else:
                hk = h_ref[...]
            # bf16 x bf16 -> f32 accumulate: adjacency 0/1 is exact in bf16, so
            # the aggregation equals f32-adj @ bf16-rounded-features exactly.
            acc_ref[...] += jnp.dot(adj_ref[...], hk,
                                    preferred_element_type=jnp.float32)

        @pl.when(j == pl.num_programs(1) - 1)
        def _():
            # mean over in-neighbors (self-loop fold already handled deg == 0)
            agg = acc_ref[...] * inv_deg_ref[...]
            y = jnp.dot(agg, wt_ref[...],
                        preferred_element_type=jnp.float32) + b_ref[...]
            out_ref[...] = jnp.maximum(y, 0.0).astype(out_ref.dtype)

    return kernel


def gcn_forward(adj, feature, weight, bias, *, tm=256, tk=512,
                out_dtype=jnp.float32):
    """adj: (N,N) f32 dense adjacency (A[v,u]=1 for edge u->v);
    feature: (N,F_in) f32; weight: (F_out,F_in) f32 (torch.nn.Linear layout);
    bias: (F_out,) f32.  Not meant to be jit-ed: the block-sparse schedule is
    data-dependent and built host-side."""
    assert tm % 128 == 0 and tk % 128 == 0
    n, f_in = feature.shape
    f_out = weight.shape[0]

    fi_p = _round_up(f_in, 128)            # lane-dense MXU operands
    fo_p = _round_up(f_out, 128)           # lane-dense output stores
    n_p = _round_up(n, math.lcm(tm, tk))   # tm/tk (and their halves) divide n_p

    # ---- host-side prep (numpy): pad, self-loop fold, degrees, schedule -----
    adj_np = np.asarray(jax.device_get(adj), dtype=np.float32)
    feat_np = np.asarray(jax.device_get(feature), dtype=np.float32)
    w_np = np.asarray(jax.device_get(weight), dtype=np.float32)
    b_np = np.asarray(jax.device_get(bias), dtype=np.float32)

    adj_p = np.zeros((n_p, n_p), np.float32)
    adj_p[:n, :n] = adj_np
    deg = adj_p.sum(axis=1)
    # zero-in-degree real nodes: add a self-loop (mean over {v} == keep own h);
    # adjacency stays exactly 0/1 so bf16 storage remains exact.
    sel = np.nonzero((deg == 0.0) & (np.arange(n_p) < n))[0]
    adj_p[sel, sel] = 1.0
    deg[sel] = 1.0
    inv_deg_np = (1.0 / np.maximum(deg, 1.0)).astype(np.float32).reshape(n_p, 1)

    h_np = np.zeros((n_p, fi_p), np.float32)
    h_np[:n, :f_in] = feat_np
    wt_np = np.zeros((fi_p, fo_p), np.float32)
    wt_np[:f_in, :f_out] = w_np.T            # pre-transposed Linear weight
    bias_np = np.zeros((1, fo_p), np.float32)
    bias_np[0, :f_out] = b_np

    # ---- per-generation VMEM budget, tile sizing, feature residency ---------
    try:
        vmem_cap = int(pltpu.get_tpu_info().vmem_capacity_bytes)
    except Exception:
        vmem_cap = 64 << 20                  # conservative (v7x) fallback
    budget = min(int(vmem_cap * 0.75), 112 << 20)   # ~48 MiB v7x, ~96 MiB v5e/v6e

    out_bytes = np.dtype(out_dtype).itemsize

    def vmem_estimate(_tm, _tk, resident):
        est = 2 * _tm * _tk * 2                                   # adj tiles (bf16)
        est += (2 * n_p * fi_p * 2) if resident else (2 * _tk * fi_p * 2)  # h (bf16)
        est += 2 * _tm * 128 * 4                                  # (tm,1) pads to 128 lanes
        est += 2 * fi_p * fo_p * 4                                # W^T (count pipeline bufs)
        est += 2 * 8 * fo_p * 4                                   # bias (pads to 8 sublanes)
        est += 2 * _tm * fo_p * out_bytes                         # output tiles
        est += _tm * fi_p * 4                                     # f32 accumulator scratch
        return est

    h_resident = vmem_estimate(tm, tk, True) <= budget
    if not h_resident:
        while vmem_estimate(tm, tk, False) > budget and tk > 128:
            tk //= 2
        while vmem_estimate(tm, tk, False) > budget and tm > 128:
            tm //= 2

    num_i = n_p // tm        # >= 2 since n_p >= lcm(256,512) = 512 and tm <= 256
    num_k = n_p // tk

    # block-sparse neighbor schedule: per row tile, the list of k-tiles with edges
    tile_nnz = adj_p.reshape(num_i, tm, num_k, tk).sum(axis=(1, 3)) > 0.0
    kcount = tile_nnz.sum(axis=1).astype(np.int32)                 # (num_i,)
    k_max = max(1, int(kcount.max()))
    ktile_ids = np.zeros((num_i, k_max), np.int32)
    for i in range(num_i):
        ids = np.nonzero(tile_nnz[i])[0].astype(np.int32)
        if ids.size:
            ktile_ids[i, :ids.size] = ids
            ktile_ids[i, ids.size:] = ids[-1]   # repeat last -> DMA skipped

    # ---- device arrays -------------------------------------------------------
    adj_bf16 = jnp.asarray(adj_p).astype(jnp.bfloat16)   # 0/1 exact in bf16
    h_bf16 = jnp.asarray(h_np).astype(jnp.bfloat16)
    inv_deg = jnp.asarray(inv_deg_np)
    wt_p = jnp.asarray(wt_np)
    b_p = jnp.asarray(bias_np)
    ktile_ids_j = jnp.asarray(ktile_ids)
    kcount_j = jnp.asarray(kcount)

    if h_resident:
        h_spec = pl.BlockSpec((n_p, fi_p), lambda i, j, kt, kc: (0, 0))
    else:
        h_spec = pl.BlockSpec((tk, fi_p), lambda i, j, kt, kc: (kt[i, j], 0))

    kernel = make_gcn_kernel(h_resident=h_resident, tk=tk)

    out_p = pl.pallas_call(
        kernel,
        out_shape=jax.ShapeDtypeStruct((n_p, fo_p), out_dtype),
        grid_spec=pltpu.PrefetchScalarGridSpec(
            num_scalar_prefetch=2,
            grid=(num_i, k_max),
            in_specs=[
                pl.BlockSpec((tm, tk), lambda i, j, kt, kc: (i, kt[i, j])),   # adj
                h_spec,                                                       # features
                pl.BlockSpec((tm, 1), lambda i, j, kt, kc: (i, 0)),           # 1/deg
                pl.BlockSpec((fi_p, fo_p), lambda i, j, kt, kc: (0, 0)),      # W^T resident
                pl.BlockSpec((1, fo_p), lambda i, j, kt, kc: (0, 0)),         # bias resident
            ],
            out_specs=pl.BlockSpec((tm, fo_p), lambda i, j, kt, kc: (i, 0)),
            scratch_shapes=[pltpu.VMEM((tm, fi_p), jnp.float32)],
        ),
        compiler_params=pltpu.CompilerParams(
            dimension_semantics=("parallel", "arbitrary"),
            vmem_limit_bytes=int(budget)),
    )(ktile_ids_j, kcount_j, adj_bf16, h_bf16, inv_deg, wt_p, b_p)

    return out_p[:n, :f_out]


def gcn_reference(adj, feature, weight, bias):
    deg = jnp.sum(adj, axis=1, keepdims=True)
    msg = jnp.dot(adj, feature, precision=jax.lax.Precision.HIGHEST)
    mean_msg = msg / jnp.maximum(deg, 1.0)
    agg = jnp.where(deg > 0, mean_msg, feature)
    y = jnp.dot(agg, weight.T, precision=jax.lax.Precision.HIGHEST) + bias
    return jnp.maximum(y, 0.0)


if __name__ == "__main__":
    key = jax.random.PRNGKey(0)
    k_adj, k_feat, k_w, k_b = jax.random.split(key, 4)

    N = 16          # number of nodes
    IN_FEATS = 32   # in_feats
    OUT_FEATS = 32  # out_feats

    # deterministic random directed graph (dense adjacency, A[v,u]=1 for u->v)
    adj = (jax.random.uniform(k_adj, (N, N)) < 0.3).astype(jnp.float32)
    feature = jax.random.normal(k_feat, (N, IN_FEATS), dtype=jnp.float32)

    # nn.Linear(in_feats, out_feats) parameter shapes, deterministic init
    bound = 1.0 / (IN_FEATS ** 0.5)
    weight = jax.random.uniform(k_w, (OUT_FEATS, IN_FEATS),
                                minval=-bound, maxval=bound, dtype=jnp.float32)
    bias = jax.random.uniform(k_b, (OUT_FEATS,),
                              minval=-bound, maxval=bound, dtype=jnp.float32)

    out = gcn_forward(adj, feature, weight, bias)
    out = jax.block_until_ready(out)

    # 1) structural check: same bf16 rounding applied to features, tight tol
    feat_bf = feature.astype(jnp.bfloat16).astype(jnp.float32)
    ref_bf = gcn_reference(adj, feat_bf, weight, bias)
    # 2) spec-level check against the full-f32 reference (bf16 feature storage
    #    introduces ~2^-8 relative rounding; tolerance covers it)
    ref_f32 = gcn_reference(adj, feature, weight, bias)

    assert out.shape == (N, OUT_FEATS)
    assert jnp.allclose(out, ref_bf, atol=3e-3, rtol=3e-3), "mismatch vs bf16-rounded reference"
    assert jnp.allclose(out, ref_f32, atol=3e-2, rtol=3e-2), "mismatch vs f32 reference"

    print("KERNEL_OK")
</pallas_src>

<mosaic_0001>
module attributes {stable_mosaic.version = 11 : i64} {
  func.func @kernel(%arg0: i32, %arg1: i32, %arg2: memref<2x1xi32, #tpu.memory_space<smem>>, %arg3: memref<2xi32, #tpu.memory_space<smem>>, %arg4: memref<256x512xbf16, #tpu.memory_space<vmem>>, %arg5: memref<512x128xbf16, #tpu.memory_space<vmem>>, %arg6: memref<256x1xf32, #tpu.memory_space<vmem>>, %arg7: memref<128x128xf32, #tpu.memory_space<vmem>>, %arg8: memref<1x128xf32, #tpu.memory_space<vmem>>, %arg9: memref<256x128xf32, #tpu.memory_space<vmem>>, %arg10: memref<256x128xf32, #tpu.memory_space<vmem>>) attributes {dimension_semantics = [#tpu.dimension_semantics<parallel>, #tpu.dimension_semantics<arbitrary>], iteration_bounds = array<i64: 2, 1>, scalar_prefetch = 2 : i64, scratch_operands = 1 : i64, tpu.core_type = #tpu.core_type<tc>, window_params = [{transform_indices = @transform_0, window_bounds = array<i64: 256, 512>}, {pipeline_mode = #tpu.pipeline_mode<synchronous>, transform_indices = @transform_1, window_bounds = array<i64: 512, 128>}, {transform_indices = @transform_2, window_bounds = array<i64: 256, 1>}, {pipeline_mode = #tpu.pipeline_mode<synchronous>, transform_indices = @transform_3, window_bounds = array<i64: 128, 128>}, {pipeline_mode = #tpu.pipeline_mode<synchronous>, transform_indices = @transform_4, window_bounds = array<i64: 1, 128>}, {transform_indices = @transform_5, window_bounds = array<i64: 256, 128>}]} {
    %c0_i32 = arith.constant 0 : i32
    %0 = arith.cmpi eq, %arg1, %c0_i32 : i32
    %1 = arith.extui %0 : i1 to i32
    %c0_i32_0 = arith.constant 0 : i32
    %2 = arith.cmpi ne, %1, %c0_i32_0 : i32
    scf.if %2 {
      %cst = arith.constant 0.000000e+00 : f32
      %11 = vector.broadcast %cst : f32 to vector<256x128xf32>
      %c0 = arith.constant 0 : index
      %c0_4 = arith.constant 0 : index
      %12 = vector.load %arg10[%c0, %c0_4] : memref<256x128xf32, #tpu.memory_space<vmem>>, vector<256x128xf32>
      tpu.vector_store %arg10[%c0, %c0_4], %11 {strides = array<i32>} : memref<256x128xf32, #tpu.memory_space<vmem>>, vector<256x128xf32>,
    } else {
    }
    %3 = arith.index_cast %arg0 : i32 to index
    %4 = memref.load %arg3[%3] : memref<2xi32, #tpu.memory_space<smem>>
    %5 = arith.cmpi slt, %arg1, %4 : i32
    %6 = arith.extui %5 : i1 to i32
    %c0_i32_1 = arith.constant 0 : i32
    %7 = arith.cmpi ne, %6, %c0_i32_1 : i32
    scf.if %7 {
      %11 = arith.index_cast %arg0 : i32 to index
      %12 = arith.index_cast %arg1 : i32 to index
      %13 = memref.load %arg2[%11, %12] : memref<2x1xi32, #tpu.memory_space<smem>>
      %c512_i32 = arith.constant 512 : i32
      %14 = arith.muli %13, %c512_i32 : i32
      %15 = tpu.assume_multiple %14, 512 : i32
      %16 = arith.index_cast %15 : i32 to index
      %c0 = arith.constant 0 : index
      %17 = vector.load %arg5[%16, %c0] : memref<512x128xbf16, #tpu.memory_space<vmem>>, vector<512x128xbf16>
      %c0_4 = arith.constant 0 : index
      %c0_5 = arith.constant 0 : index
      %18 = vector.load %arg10[%c0_4, %c0_5] : memref<256x128xf32, #tpu.memory_space<vmem>>, vector<256x128xf32>
      %c0_6 = arith.constant 0 : index
      %c0_7 = arith.constant 0 : index
      %19 = vector.load %arg4[%c0_6, %c0_7] : memref<256x512xbf16, #tpu.memory_space<vmem>>, vector<256x512xbf16>
      %cst = arith.constant dense<0.000000e+00> : vector<256x128xf32>
      %20 = tpu.matmul %19, %17, %cst {dimension_numbers = #tpu.dot_dimension_numbers<[1], [0], [0], [1], [0, 0, 1, 1], [], []>} : vector<256x512xbf16>, vector<512x128xbf16>, vector<256x128xf32> -> vector<256x128xf32>
      %21 = arith.addf %18, %20 : vector<256x128xf32>
      %c0_8 = arith.constant 0 : index
      %c0_9 = arith.constant 0 : index
      %22 = vector.load %arg10[%c0_8, %c0_9] : memref<256x128xf32, #tpu.memory_space<vmem>>, vector<256x128xf32>
      tpu.vector_store %arg10[%c0_8, %c0_9], %21 {strides = array<i32>} : memref<256x128xf32, #tpu.memory_space<vmem>>, vector<256x128xf32>,
    } else {
    }
    %c0_i32_2 = arith.constant 0 : i32
    %8 = arith.cmpi eq, %arg1, %c0_i32_2 : i32
    %9 = arith.extui %8 : i1 to i32
    %c0_i32_3 = arith.constant 0 : i32
    %10 = arith.cmpi ne, %9, %c0_i32_3 : i32
    scf.if %10 {
      %c0 = arith.constant 0 : index
      %c0_4 = arith.constant 0 : index
      %11 = vector.load %arg10[%c0, %c0_4] : memref<256x128xf32, #tpu.memory_space<vmem>>, vector<256x128xf32>
      %c0_5 = arith.constant 0 : index
      %c0_6 = arith.constant 0 : index
      %12 = vector.load %arg6[%c0_5, %c0_6] : memref<256x1xf32, #tpu.memory_space<vmem>>, vector<256x1xf32>
      %13 = vector.broadcast %12 : vector<256x1xf32> to vector<256x128xf32>
      %14 = arith.mulf %11, %13 : vector<256x128xf32>
      %c0_7 = arith.constant 0 : index
      %c0_8 = arith.constant 0 : index
      %15 = vector.load %arg7[%c0_7, %c0_8] : memref<128x128xf32, #tpu.memory_space<vmem>>, vector<128x128xf32>
      %cst = arith.constant dense<0.000000e+00> : vector<256x128xf32>
      %16 = tpu.matmul %14, %15, %cst {dimension_numbers = #tpu.dot_dimension_numbers<[1], [0], [0], [1], [0, 0, 1, 1], [], []>} : vector<256x128xf32>, vector<128x128xf32>, vector<256x128xf32> -> vector<256x128xf32>
      %c0_9 = arith.constant 0 : index
      %c0_10 = arith.constant 0 : index
      %17 = vector.load %arg8[%c0_9, %c0_10] : memref<1x128xf32, #tpu.memory_space<vmem>>, vector<1x128xf32>
      %18 = vector.broadcast %17 : vector<1x128xf32> to vector<256x128xf32>
      %19 = arith.addf %16, %18 : vector<256x128xf32>
      %cst_11 = arith.constant 0.000000e+00 : f32
      %20 = vector.broadcast %cst_11 : f32 to vector<256x128xf32>
      %21 = arith.maximumf %19, %20 : vector<256x128xf32>
      %c0_12 = arith.constant 0 : index
      %c0_13 = arith.constant 0 : index
      %22 = vector.load %arg9[%c0_12, %c0_13] : memref<256x128xf32, #tpu.memory_space<vmem>>, vector<256x128xf32>
      tpu.vector_store %arg9[%c0_12, %c0_13], %21 {strides = array<i32>} : memref<256x128xf32, #tpu.memory_space<vmem>>, vector<256x128xf32>,
    } else {
    }
    return
  }
  func.func @transform_0(%arg0: i32, %arg1: i32, %arg2: memref<2x1xi32, #tpu.memory_space<smem>>, %arg3: memref<2xi32, #tpu.memory_space<smem>>) -> (i32, i32) {
    %0 = arith.index_cast %arg0 : i32 to index
    %1 = arith.index_cast %arg1 : i32 to index
    %2 = memref.load %arg2[%0, %1] : memref<2x1xi32, #tpu.memory_space<smem>>
    %c0_i32 = arith.constant 0 : i32
    return %arg0, %2 : i32, i32
  }
  func.func @transform_1(%arg0: i32, %arg1: i32, %arg2: memref<2x1xi32, #tpu.memory_space<smem>>, %arg3: memref<2xi32, #tpu.memory_space<smem>>) -> (i32, i32) {
    %c0_i32 = arith.constant 0 : i32
    %c0_i32_0 = arith.constant 0 : i32
    %c0_i32_1 = arith.constant 0 : i32
    return %c0_i32, %c0_i32_0 : i32, i32
  }
  func.func @transform_2(%arg0: i32, %arg1: i32, %arg2: memref<2x1xi32, #tpu.memory_space<smem>>, %arg3: memref<2xi32, #tpu.memory_space<smem>>) -> (i32, i32) {
    %c0_i32 = arith.constant 0 : i32
    %c0_i32_0 = arith.constant 0 : i32
    return %arg0, %c0_i32 : i32, i32
  }
  func.func @transform_3(%arg0: i32, %arg1: i32, %arg2: memref<2x1xi32, #tpu.memory_space<smem>>, %arg3: memref<2xi32, #tpu.memory_space<smem>>) -> (i32, i32) {
    %c0_i32 = arith.constant 0 : i32
    %c0_i32_0 = arith.constant 0 : i32
    %c0_i32_1 = arith.constant 0 : i32
    return %c0_i32, %c0_i32_0 : i32, i32
  }
  func.func @transform_4(%arg0: i32, %arg1: i32, %arg2: memref<2x1xi32, #tpu.memory_space<smem>>, %arg3: memref<2xi32, #tpu.memory_space<smem>>) -> (i32, i32) {
    %c0_i32 = arith.constant 0 : i32
    %c0_i32_0 = arith.constant 0 : i32
    %c0_i32_1 = arith.constant 0 : i32
    return %c0_i32, %c0_i32_0 : i32, i32
  }
  func.func @transform_5(%arg0: i32, %arg1: i32, %arg2: memref<2x1xi32, #tpu.memory_space<smem>>, %arg3: memref<2xi32, #tpu.memory_space<smem>>) -> (i32, i32) {
    %c0_i32 = arith.constant 0 : i32
    %c0_i32_0 = arith.constant 0 : i32
    return %arg0, %c0_i32 : i32, i32
  }
}

</mosaic_0001>

<bundles_post_ra>
// kernel: tpu_custom_call.1
= control target key start
LH: loop header
LB: loop body
LE: loop exit
PB: predicated region body
PF: predicated region fallthrough
CT: control target
= control target key end

     0   :  { %s2873_s30 = smov [#allocation4]   ;;  %s2874_s8 = smov [#allocation5]   ;;  %s3442_s0 = inlined_call_operand.vmem [shape: s32[2,1], index: 0, kind: input, shape index: {}]   ;;  %s3443_s2 = inlined_call_operand.hbm [shape: bf16[512,512], index: 2, kind: input, shape index: {}]   ;;  %s3444_s3 = inlined_call_operand.vmem [shape: bf16[512,128], index: 3, kind: input, shape index: {}]   ;;  %s3445_s4 = inlined_call_operand.vmem [shape: f32[512,1], index: 4, kind: input, shape index: {}]   ;;  %s3446_s5 = inlined_call_operand.vmem [shape: f32[128,128], index: 5, kind: input, shape index: {}]   ;;  %s3447_s6 = inlined_call_operand.vmem [shape: f32[1,128], index: 6, kind: input, shape index: {}]   ;;  %s3448_s7 = inlined_call_operand.hbm [shape: f32[512,128], index: 7, kind: output, shape index: {}]   ;;  %s3449_s1 = inlined_call_operand.vmem [shape: s32[2], index: 1, kind: input, shape index: {}]  }
   0x1   :  { %s13_s26 = sshll.u32 %s3442_s0, 4  ;;  %s18_s29 = sshll.u32 %s3449_s1, 4  ;;  %s14_s26 = int_to_ptr.vmem [resolvable:$true] %s13_s26  ;;  %s19_s29 = int_to_ptr.vmem [resolvable:$true] %s18_s29 }
   0x2   :  { %16 = dma.vmem_to_smem %s14_s26, 32, %s2873_s30, [#allocation3] }
   0x3   :  { %21 = dma.vmem_to_smem %s19_s29, 16, %s2874_s8, [#allocation3] }
   0x4   :  { %2827 = dma.done.wait [#allocation3], 48 }
   0x5   :  { %2828 = vsyncadd [#allocation3], 4294967248 }
   0x6   :  { %24 = sfence }
   0x7   :  { %25 = vsyncpa [#allocation7], 0 }
   0x8   :  { %27 = vsyncpa [#allocation7 + $0x1], 0 }
   0x9   :  { %28 = vsyncpa [#allocation8], 0 }
   0xa   :  { %30 = vsyncpa [#allocation8 + $0x1], 0  ;;  %s2927_s9 = smov 0   ;;  %s2929_s0 = smov 0  }
   0xb   :  { %s2931_s10 = smov 0   ;;  %s2933_s1 = smov 0  }
   0xc   :  { %s2935_s11 = smov 0   ;;  %s2937_s12 = smov 0  }
   0xd   :  { %s2939_s13 = smov 0   ;;  %s2941_s14 = smov 0  }
   0xe   :  { %s2943_s15 = smov 0  }
   0xf LB: > { %3454 = sst [smem:[#allocation15_spill]] %s2847_s10  ;;  %s2050_s16 = sadd.s32 4294967295, %s2871_s15   ;;  %s2871_s15 = sphi %s2943_s15, %s36_s15   ;;  %s2867_s14 = sphi %s2941_s14, %s3471_s14   ;;  %s2863_s13 = sphi %s2939_s13, %s3470_s13   ;;  %s2859_s12 = sphi %s2937_s12, %s3469_s12   ;;  %s2855_s11 = sphi %s2935_s11, %s3475_s11   ;;  %s2851_s1 = sphi %s2933_s1, %s3474_s1   ;;  %s2847_s10 = sphi %s2931_s10, %s3467_s10   ;;  %s2843_s0 = sphi %s2929_s0, %s3473_s0   ;;  %s2839_s9 = sphi %s2927_s9, %s3472_s9  }
  0x10   : > { %3455 = sst [smem:[#allocation16_spill]] %s2859_s12  ;;  %s2051_s17 = sadd.s32 4294967294, %s2871_s15  }
  0x11   : > { %3456 = sst [smem:[#allocation17_spill]] %s2867_s14  ;;  %s48_s18 = sadd.s32 1, %s2867_s14 }
  0x12   : > { %s2974_s19 = sshll.u32 %s2867_s14, 7  ;;  %p50_p0 = scmp.ge.s32.totalorder %s48_s18, 2 }
  0x13   : > { %s59_s20 = sld [smem:[#allocation4 + %s2974_s19]]  ;;  %s73_s21 = sadd.s32 1, %s2859_s12 }
  0x14   : > { %p80_p1 = scmp.ne.s32.totalorder %s2859_s12, %s2855_s11  ;;  %s3477_s18 = smov (%p50_p0, %s48_s18), 0 }
  0x15   : > { %3457 = sst [smem:[#allocation18_spill]] %s3477_s18  ;;  %p81_p2 = scmp.eq.s32.totalorder %s2871_s15, 0 }
  0x16   : > { %p86_p3 = scmp.ne.s32.totalorder %s2855_s11, %s2851_s1  ;;  %s2053_s22 = sshll.u32 %s3477_s18, 7 }
  0x17   : > { %s68_s23 = ssub.s32 %s2867_s14, %s3477_s18  ;;  %s67_s24 = sld [smem:[#allocation4 + %s2053_s22]] }
  0x18   : > { %p2987_p4 = por %p81_p2, %p80_p1  ;;  %p87_p5 = scmp.eq.s32.totalorder %s2050_s16, 0 }
  0x19   : > { %p186_p6 = scmp.eq.s32.totalorder %s68_s23, 0  ;;  %s188_s26 = sadd.s32 1, %s2847_s10 }
  0x1a   : > { %p198_p7 = scmp.ne.s32.totalorder %s2847_s10, %s2843_s0  ;;  %p2994_p8 = por %p87_p5, %p86_p3 }
  0x1b   : > { %p199_p9 = scmp.eq.s32.totalorder %s2050_s16, 1  ;;  %p204_p11 = scmp.ne.s32.totalorder %s2843_s0, %s2839_s9 }
  0x1c   : > { %s2999_s28 = scalar_select %p186_p6, %s2847_s10, %s188_s26  }
  0x1d   : > { %p3001_p10 = por %p199_p9, %p198_p7  ;;  %s69_s30 = ssub.s32 %s59_s20, %s67_s24 }
  0x1e   : > { %3460 = sst [smem:[#allocation19_spill]] %s2999_s28  ;;  %p205_p12 = scmp.eq.s32.totalorder %s2051_s17, 1 }
  0x1f   : > { %s70_s8 = sor.u32 %s69_s30, %s68_s23  ;;  %p2055_p13 = scmp.ge.s32.totalorder %s2871_s15, 2 }
  0x20   : > { %p71_p0 = scmp.eq.s32.totalorder %s70_s8, 0  ;;  %p3008_p1 = por %p205_p12, %p204_p11 }
  0x21   : > { %p2623_p2 = scmp.lt.s32.totalorder %s2871_s15, 2  ;;  %s234_s16 = sand.u32 1, %s2859_s12  }
  0x22   : > { %s3015_s22 = scalar_select %p71_p0, %s2859_s12, %s73_s21  }
  0x23   : > { %s2056_s26 = sshll.u32 %s234_s16, 9  ;;  %p3019_p3 = pnand %p2623_p2, %p2987_p4 }
  0x24   : > { %3463 = sst [smem:[#allocation20_spill]] %s3015_s22  ;;  %p2062_p5 = scmp.ge.s32.totalorder %s2871_s15, 1 }
  0x25   : > { %s2607_s17 = scalar_select %p2987_p4, [#allocation4], [#allocation10] }
  0x26   : > { %s2608_s20 = scalar_select %p2987_p4, %s2974_s19, 0 }
  0x27   : > { %s3479_s17 = smov (!%p2623_p2, %s2607_s17), [#allocation11]  ;;  %p274_p6 = scmp.lt.s32.totalorder %s2871_s15, 3 }
  0x28   : > { %s3481_s20 = smov (!%p2623_p2, %s2608_s20), 0  ;;  %s238_s24 = scalar_lea.vmem [#allocation6], %s2056_s26 }
  0x29   : > { %s246_s23 = sld [smem:[%s3479_s17 + %s3481_s20]]  ;;  %s3030_s30 = sshll.u32 %s238_s24, 4  ;;  %s258_s30 = int_to_ptr.vmem [resolvable:$true] %s3030_s30 }
  0x2a   : > { %p3032_p7 = pnand %p2062_p5, %p274_p6  ;;  %s235_s20 = scalar_lea.sflag [#allocation7], %s234_s16 }
  0x2b   : > { %p2737_p9 = pneg %p3019_p3 }
  0x2f   : > { %s2059_s8 = sshll.u32 %s246_s23, 2 }
  0x30   : > { %s252_s14 = sadd.s32 %s2059_s8, %s2974_s19  ;;  %s2740_s19 = scalar_lea.hbm %s3443_s2, 1024 }
  0x31   : > { %s2061_s22 = sshll.u32 %s252_s14, 2 }
  0x32   : > { %s254_s28 = scalar_lea.hbm %s3443_s2, %s2061_s22 }
  0x33   : > { %s255_s17 = sshll.u32 %s254_s28, 4  ;;  %s256_s17 = int_to_ptr.hbm [resolvable:$true] %s255_s17 }
  0x34   : > { %s2733_s10 = sshra.s32 %s256_s17, 4  ;;  %s2734_s10 = int_to_ptr.hbm [resolvable:$true] %s2733_s10 }
  0x35   : > { %s2735_s26 = scalar_lea.hbm %s2734_s10, 512  ;;  %p2741_p0 = scmp.lt.s32.totalorder %s2734_s10, %s3443_s2 }
  0x36   : > { %p2736_p4 = scmp.ne.s32.totalorder %s2734_s10, %s2735_s26  ;;  %p2742_p2 = scmp.lt.s32.totalorder %s2740_s19, %s2735_s26 }
  0x38   : > { %p2738_p11 = pnand %p2737_p9, %p2736_p4  ;;  %p2743_p5 = por %p2742_p2, %p2741_p0 }
  0x3a   : > { %p2739_p12 = pneg %p2738_p11 }
  0x3c   : > { %p2744_p6 = pnand %p2743_p5, %p2739_p12 }
  0x3e   : > { %2747 = shalt.err (!%p2744_p6)
}
  0x3f   : > { %s2875_s12 = smov 256   ;;  %s2876_s28 = smov 16  }
  0x40   : > { %2618 = dma.hbm_to_vmem [thread:$0]  (!%p3019_p3), %s256_s17, 8192, %s258_s30, %s235_s20, %s2875_s12, %s2875_s12, %s2876_s28  }
  0x41   : > { %278 = sbr.rel (%p3032_p7) target bundleno = 860 (0x35c), region = 40  ;;  %s280_s16 = sand.u32 (!%p3032_p7), 1, %s2855_s11  }
  0x42   : > { %s2063_s22 = sshll.u32 (!%p3032_p7), %s280_s16, 9  ;;  %s281_s25 = scalar_lea.sflag (!%p3032_p7), [#allocation7], %s280_s16 }
  0x43   : > { %s3054_s24 = scalar_lea.vmem (!%p3032_p7), [#allocation6], %s2063_s22 }
  0x46   : > { %2830 = dma.done.wait (%p2994_p8), %s281_s25, 8192  }
  0x47   : > { %2832 = vsyncadd (%p2994_p8), %s281_s25, 4294959104  ;;  %s314_s10 = sand.u32 1, %s2843_s0   ;;  %s2065_s18 = sshll.u32 %s2863_s13, 5  ;;  %v2877_v0 = vmov 0.0  }
  0x48   : > { %s3063_s30 = sld [smem:[#allocation5 + %s2863_s13]]  ;;  %s3067_s21 = sshll.u32 %s314_s10, 8  ;;  %338 = vst [vmem:[#allocation2 + $0xb0] sm:$0xff] %v2877_v0 }
  0x49   : > { %p328_p3 = scmp.lt.s32.totalorder %s2065_s18, 63  ;;  %339 = vst [vmem:[#allocation2] sm:$0xff] %v2877_v0  ;;  %s3075_s23 = scalar_lea.vmem [#allocation9], %s3067_s21 }
  0x4a   : > { %340 = vst [vmem:[#allocation2 + $0xd8] sm:$0xff] %v2877_v0 }
  0x4b   : > { %s3483_s18 = smov (!%p328_p3, %s2065_s18), 63  ;;  %341 = vst [vmem:[#allocation2 + $0x18] sm:$0xff] %v2877_v0 }
  0x4c   : > { %342 = vst [vmem:[#allocation2 + $0x50] sm:$0xff] %v2877_v0  ;;  %s2066_s27 = sshll.u32 %s3483_s18, 3 }
  0x4d   : > { %343 = vst [vmem:[#allocation2 + $0x68] sm:$0xff] %v2877_v0  ;;  %s3072_s26 = scalar_lea.vmem %s3445_s4, %s2066_s27 }
  0x4e   : > { %344 = vst [vmem:[#allocation2 + $0x30] sm:$0xff] %v2877_v0  ;;  %p2068_p8 = scmp.le.s32.totalorder %s3063_s30, 0 }
  0x4f   : > { %345 = vst [vmem:[#allocation2 + $0x48] sm:$0xff] %v2877_v0  ;;  %s2069_s19 = sshll.u32 (!%p2068_p8), %s2863_s13, 7 }
  0x50   : > { %346 = vst [vmem:[#allocation2 + $0x80] sm:$0xff] %v2877_v0  ;;  %s382_s14 = sld [smem:[#allocation4 + %s2069_s19]] (!%p2068_p8) }
  0x51   : > { %347 = vst [vmem:[#allocation2 + $0x88] sm:$0xff] %v2877_v0 }
  0x52   : > { %348 = vst [vmem:[#allocation2 + $0xe8] sm:$0xff] %v2877_v0 }
  0x53   : > { %349 = vst [vmem:[#allocation2 + $0xb8] sm:$0xff] %v2877_v0 }
  0x54   : > { %350 = vst [vmem:[#allocation2 + $0x60] sm:$0xff] %v2877_v0 }
  0x55   : > { %351 = vst [vmem:[#allocation2 + $0xf0] sm:$0xff] %v2877_v0 }
  0x56   : > { %352 = vst [vmem:[#allocation2 + $0x8] sm:$0xff] %v2877_v0  ;;  %s2070_s8 = sshll.u32 (!%p2068_p8), %s382_s14, 9 }
  0x57   : > { %353 = vst [vmem:[#allocation2 + $0x78] sm:$0xff] %v2877_v0  ;;  %s384_s12 = sshra.s32 (!%p2068_p8), %s2070_s8, 3 }
  0x58   : > { %354 = vst [vmem:[#allocation2 + $0x38] sm:$0xff] %v2877_v0  ;;  %s2071_s28 = sshll.u32 (!%p2068_p8), %s384_s12, 2 }
  0x59   : > { %355 = vst [vmem:[#allocation2 + $0x58] sm:$0xff] %v2877_v0  ;;  %s3082_s25 = scalar_lea.vmem (!%p2068_p8), %s3444_s3, %s2071_s28 }
  0x5a   : > { %356 = vst [vmem:[#allocation2 + $0x40] sm:$0xff] %v2877_v0 }
  0x5b   : > { %357 = vst [vmem:[#allocation2 + $0xc8] sm:$0xff] %v2877_v0 }
  0x5c   : > { %358 = vst [vmem:[#allocation2 + $0xe0] sm:$0xff] %v2877_v0 }
  0x5d   : > { %359 = vst [vmem:[#allocation2 + $0x90] sm:$0xff] %v2877_v0 }
  0x5e   : > { %360 = vst [vmem:[#allocation2 + $0x70] sm:$0xff] %v2877_v0 }
  0x5f   : > { %361 = vst [vmem:[#allocation2 + $0xc0] sm:$0xff] %v2877_v0 }
  0x60   : > { %362 = vst [vmem:[#allocation2 + $0xa8] sm:$0xff] %v2877_v0 }
  0x61   : > { %363 = vst [vmem:[#allocation2 + $0xd0] sm:$0xff] %v2877_v0 }
  0x62   : > { %364 = vst [vmem:[#allocation2 + $0x10] sm:$0xff] %v2877_v0 }
  0x63   : > { %365 = vst [vmem:[#allocation2 + $0x28] sm:$0xff] %v2877_v0  ;;  %374 = sbr.rel (%p2068_p8) target bundleno = 525 (0x20d), region = 52 }
  0x64   : > { %366 = vst [vmem:[#allocation2 + $0xa0] sm:$0xff] %v2877_v0 }
  0x65   : > { %367 = vst [vmem:[#allocation2 + $0xf8] sm:$0xff] %v2877_v0 }
  0x66   : > { %368 = vst [vmem:[#allocation2 + $0x20] sm:$0xff] %v2877_v0 }
  0x67   : > { %369 = vst [vmem:[#allocation2 + $0x98] sm:$0xff] %v2877_v0 }
  0x68   : > { %v2469_v1 = vld [vmem:[%s3082_s25 + $0x38] sm:$0xff]  ;;  %v2468_v5 = vld [vmem:[%s3082_s25 + $0x30] sm:$0xff]  ;;  %v2467_v9 = vld [vmem:[%s3082_s25 + $0x28] sm:$0xff] }
  0x69   : > { %v2477_v2 = vld [vmem:[%s3082_s25 + $0x78] sm:$0xff]  ;;  %1060 = vmatpush.bf16.msra.mxu0 %v2469_v1  ;;  %v2476_v6 = vld [vmem:[%s3082_s25 + $0x70] sm:$0xff]  ;;  %v2475_v10 = vld [vmem:[%s3082_s25 + $0x68] sm:$0xff] }
  0x6a   : > { %v2485_v3 = vld [vmem:[%s3082_s25 + $0xb8] sm:$0xff]  ;;  %1149 = vmatpush.bf16.msra.mxu1 %v2477_v2  ;;  %v2484_v7 = vld [vmem:[%s3082_s25 + $0xb0] sm:$0xff]  ;;  %v2483_v11 = vld [vmem:[%s3082_s25 + $0xa8] sm:$0xff] }
  0x6b   : > { %v2493_v4 = vld [vmem:[%s3082_s25 + $0xf8] sm:$0xff]  ;;  %1238 = vmatpush.bf16.msra.mxu2 %v2485_v3  ;;  %v2492_v8 = vld [vmem:[%s3082_s25 + $0xf0] sm:$0xff]  ;;  %v2491_v12 = vld [vmem:[%s3082_s25 + $0xe8] sm:$0xff] }
  0x6c   : > { %1327 = vmatpush.bf16.msra.mxu3 %v2493_v4  ;;  %v2466_v13 = vld [vmem:[%s3082_s25 + $0x20] sm:$0xff]  ;;  %v2465_v17 = vld [vmem:[%s3082_s25 + $0x18] sm:$0xff]  ;;  %v2464_v21 = vld [vmem:[%s3082_s25 + $0x10] sm:$0xff] }
  0x6d   : > { %1061 = vmatpush.bf16.msra.mxu0 %v2468_v5  ;;  %v2474_v14 = vld [vmem:[%s3082_s25 + $0x60] sm:$0xff]  ;;  %v2473_v18 = vld [vmem:[%s3082_s25 + $0x58] sm:$0xff]  ;;  %v2472_v22 = vld [vmem:[%s3082_s25 + $0x50] sm:$0xff] }
  0x6e   : > { %1150 = vmatpush.bf16.msra.mxu1 %v2476_v6  ;;  %v2482_v15 = vld [vmem:[%s3082_s25 + $0xa0] sm:$0xff]  ;;  %v2481_v19 = vld [vmem:[%s3082_s25 + $0x98] sm:$0xff]  ;;  %v2480_v23 = vld [vmem:[%s3082_s25 + $0x90] sm:$0xff] }
  0x6f   : > { %1239 = vmatpush.bf16.msra.mxu2 %v2484_v7  ;;  %v2490_v16 = vld [vmem:[%s3082_s25 + $0xe0] sm:$0xff]  ;;  %v2489_v20 = vld [vmem:[%s3082_s25 + $0xd8] sm:$0xff]  ;;  %v2488_v24 = vld [vmem:[%s3082_s25 + $0xd0] sm:$0xff] }
  0x70   : > { %1328 = vmatpush.bf16.msra.mxu3 %v2492_v8  ;;  %v2463_v25 = vld [vmem:[%s3082_s25 + $0x8] sm:$0xff]  ;;  %v2496_v30 = vld [vmem:[%s3054_s24 + $0xc] sm:$0xf0]  ;;  %v2462_v32 = vld [vmem:[%s3082_s25] sm:$0xff] }
  0x71   : > { %1062 = vmatpush.bf16.msra.mxu0 %v2467_v9  ;;  %v2471_v26 = vld [vmem:[%s3082_s25 + $0x48] sm:$0xff]  ;;  %v2470_v33 = vld [vmem:[%s3082_s25 + $0x40] sm:$0xff]  ;;  %v2076_v36 = vld [vmem:[%s3054_s24 + $0x10] sm:$0xf0] }
  0x72   : > { %1151 = vmatpush.bf16.msra.mxu1 %v2475_v10  ;;  %v2479_v27 = vld [vmem:[%s3082_s25 + $0x88] sm:$0xff]  ;;  %v2478_v34 = vld [vmem:[%s3082_s25 + $0x80] sm:$0xff]  ;;  %v2082_v37 = vld [vmem:[%s3054_s24 + $0x8] sm:$0xf] }
  0x73   : > { %1240 = vmatpush.bf16.msra.mxu2 %v2483_v11  ;;  %v2487_v28 = vld [vmem:[%s3082_s25 + $0xc8] sm:$0xff]  ;;  %v2486_v35 = vld [vmem:[%s3082_s25 + $0xc0] sm:$0xff]  ;;  %v2495_v39 = vld [vmem:[%s3054_s24 + $0xc] sm:$0xf] }
  0x74   : > { %1329 = vmatpush.bf16.msra.mxu3 %v2491_v12  ;;  %v2074_v29 = vld [vmem:[%s3054_s24] sm:$0xf]  ;;  %v2494_v31 = vld [vmem:[%s3054_s24 + $0x4] sm:$0xf]  ;;  %v2497_v38 = vld [vmem:[%s3054_s24 + $0x14] sm:$0xf0] }
  0x75   : > { %1063 = vmatpush.bf16.msra.mxu0 %v2466_v13  ;;  %v2084_v40 = vld [vmem:[%s3054_s24 + $0x18] sm:$0xf0]  ;;  %v2075_v41 = vor.u32 %v2496_v30, %v2074_v29  ;;  %v2079_v42 = vor.u32 %v2494_v31, %v2076_v36  ;;  %v2083_v43 = vor.u32 %v2497_v38, %v2082_v37  ;;  %v2090_v45 = vld [vmem:[%s3054_s24 + $0x20] sm:$0xf]  ;;  %v2500_v46 = vld [vmem:[%s3054_s24 + $0x2c] sm:$0xf0] }
  0x76   : > { %1152 = vmatpush.bf16.msra.mxu1 %v2474_v14  ;;  %v2087_v44 = vor.u32 %v2495_v39, %v2084_v40  ;;  %v2498_v47 = vld [vmem:[%s3054_s24 + $0x24] sm:$0xf]  ;;  %v2092_v48 = vld [vmem:[%s3054_s24 + $0x30] sm:$0xf0]  ;;  %v2098_v49 = vld [vmem:[%s3054_s24 + $0x28] sm:$0xf]  ;;  %v2091_v53 = vor.u32 %v2500_v46, %v2090_v45 }
  0x77   : > { %1241 = vmatpush.bf16.msra.mxu2 %v2482_v15  ;;  %v2501_v50 = vld [vmem:[%s3054_s24 + $0x34] sm:$0xf0]  ;;  %v2499_v51 = vld [vmem:[%s3054_s24 + $0x2c] sm:$0xf]  ;;  %v2100_v52 = vld [vmem:[%s3054_s24 + $0x38] sm:$0xf0]  ;;  %v2095_v54 = vor.u32 %v2498_v47, %v2092_v48 }
  0x78   : > { %1330 = vmatpush.bf16.msra.mxu3 %v2490_v16  ;;  %v2099_v55 = vor.u32 %v2501_v50, %v2098_v49  ;;  %v2103_v56 = vor.u32 %v2499_v51, %v2100_v52  ;;  %v2106_v57 = vld [vmem:[%s3054_s24 + $0x40] sm:$0xf]  ;;  %v2504_v58 = vld [vmem:[%s3054_s24 + $0x4c] sm:$0xf0]  ;;  %v2502_v59 = vld [vmem:[%s3054_s24 + $0x44] sm:$0xf] }
  0x79   : > { %1064 = vmatpush.bf16.msra.mxu0 %v2465_v17  ;;  %v2108_v60 = vld [vmem:[%s3054_s24 + $0x50] sm:$0xf0]  ;;  %v2114_v61 = vld [vmem:[%s3054_s24 + $0x48] sm:$0xf]  ;;  %v2505_v62 = vld [vmem:[%s3054_s24 + $0x54] sm:$0xf0]  ;;  %v2107_v1 = vor.u32 %v2504_v58, %v2106_v57 }
  0x7a   : > { %1153 = vmatpush.bf16.msra.mxu1 %v2473_v18  ;;  %v2503_v63 = vld [vmem:[%s3054_s24 + $0x4c] sm:$0xf]  ;;  %v2116_v0 = vld [vmem:[%s3054_s24 + $0x58] sm:$0xf0]  ;;  %v2111_v2 = vor.u32 %v2502_v59, %v2108_v60  ;;  %v2115_v3 = vor.u32 %v2505_v62, %v2114_v61  ;;  %v2122_v5 = vld [vmem:[%s3054_s24 + $0x60] sm:$0xf] }
  0x7b   : > { %1242 = vmatpush.bf16.msra.mxu2 %v2481_v19  ;;  %v2119_v4 = vor.u32 %v2503_v63, %v2116_v0  ;;  %v2508_v6 = vld [vmem:[%s3054_s24 + $0x6c] sm:$0xf0]  ;;  %v2506_v7 = vld [vmem:[%s3054_s24 + $0x64] sm:$0xf]  ;;  %v2124_v8 = vld [vmem:[%s3054_s24 + $0x70] sm:$0xf0] }
  0x7c   : > { %1331 = vmatpush.bf16.msra.mxu3 %v2489_v20  ;;  %v2130_v9 = vld [vmem:[%s3054_s24 + $0x68] sm:$0xf]  ;;  %v2509_v10 = vld [vmem:[%s3054_s24 + $0x74] sm:$0xf0]  ;;  %v2507_v11 = vld [vmem:[%s3054_s24 + $0x6c] sm:$0xf]  ;;  %v2123_v13 = vor.u32 %v2508_v6, %v2122_v5  ;;  %v2127_v14 = vor.u32 %v2506_v7, %v2124_v8 }
  0x7d   : > { %1065 = vmatpush.bf16.msra.mxu0 %v2464_v21  ;;  %v2132_v12 = vld [vmem:[%s3054_s24 + $0x78] sm:$0xf0]  ;;  %v2131_v15 = vor.u32 %v2509_v10, %v2130_v9  ;;  %v2138_v17 = vld [vmem:[%s3054_s24 + $0x80] sm:$0xf]  ;;  %v2512_v18 = vld [vmem:[%s3054_s24 + $0x8c] sm:$0xf0] }
  0x7e   : > { %1154 = vmatpush.bf16.msra.mxu1 %v2472_v22  ;;  %v2135_v16 = vor.u32 %v2507_v11, %v2132_v12  ;;  %v2510_v19 = vld [vmem:[%s3054_s24 + $0x84] sm:$0xf]  ;;  %v2140_v20 = vld [vmem:[%s3054_s24 + $0x90] sm:$0xf0]  ;;  %v2146_v21 = vld [vmem:[%s3054_s24 + $0x88] sm:$0xf] }
  0x7f   : > { %1243 = vmatpush.bf16.msra.mxu2 %v2480_v23  ;;  %v2513_v22 = vld [vmem:[%s3054_s24 + $0x94] sm:$0xf0]  ;;  %v2511_v23 = vld [vmem:[%s3054_s24 + $0x8c] sm:$0xf]  ;;  %v2154_v29 = vld [vmem:[%s3054_s24 + $0xa0] sm:$0xf] }
  0x80   : > { %1332 = vmatpush.bf16.msra.mxu3 %v2488_v24  ;;  %v2148_v24 = vld [vmem:[%s3054_s24 + $0x98] sm:$0xf0]  ;;  %v2516_v30 = vld [vmem:[%s3054_s24 + $0xac] sm:$0xf0]  ;;  %v2514_v31 = vld [vmem:[%s3054_s24 + $0xa4] sm:$0xf] }
  0x81   : > { %1066 = vmatpush.bf16.msra.mxu0 %v2463_v25  ;;  %v2139_v25 = vor.u32 %v2512_v18, %v2138_v17  ;;  %v2164_v36 = vld [vmem:[%s3054_s24 + $0xb8] sm:$0xf0]  ;;  %v2155_v37 = vor.u32 %v2516_v30, %v2154_v29  ;;  %v2178_v45 = vld [vmem:[%s3054_s24 + $0xc8] sm:$0xf]  ;;  %v2521_v46 = vld [vmem:[%s3054_s24 + $0xd4] sm:$0xf0] }
  0x82   : > { %1155 = vmatpush.bf16.msra.mxu1 %v2471_v26  ;;  %v2143_v26 = vor.u32 %v2510_v19, %v2140_v20  ;;  %v2519_v47 = vld [vmem:[%s3054_s24 + $0xcc] sm:$0xf]  ;;  %v2180_v48 = vld [vmem:[%s3054_s24 + $0xd8] sm:$0xf0]  ;;  %v2179_v51 = vor.u32 %v2521_v46, %v2178_v45  ;;  %v2194_v57 = vld [vmem:[%s3054_s24 + $0xe8] sm:$0xf] }
  0x83   : > { %1244 = vmatpush.bf16.msra.mxu2 %v2479_v27  ;;  %v2147_v27 = vor.u32 %v2513_v22, %v2146_v21  ;;  %v2183_v52 = vor.u32 %v2519_v47, %v2180_v48  ;;  %v2525_v58 = vld [vmem:[%s3054_s24 + $0xf4] sm:$0xf0]  ;;  %v2523_v59 = vld [vmem:[%s3054_s24 + $0xec] sm:$0xf]  ;;  %v2196_v60 = vld [vmem:[%s3054_s24 + $0xf8] sm:$0xf0] }
  0x84   : > { %1333 = vmatpush.bf16.msra.mxu3 %v2487_v28  ;;  %v2151_v28 = vor.u32 %v2511_v23, %v2148_v24  ;;  %v2195_v63 = vor.u32 %v2525_v58, %v2194_v57  ;;  %v2199_v0 = vor.u32 %v2523_v59, %v2196_v60  ;;  %v2210_v5 = vld [vmem:[%s3054_s24 + $0x108] sm:$0xf]  ;;  %v2529_v6 = vld [vmem:[%s3054_s24 + $0x114] sm:$0xf0]  ;;  %v2527_v7 = vld [vmem:[%s3054_s24 + $0x10c] sm:$0xf] }
  0x85   : > { %1067 = vmatpush.bf16.msra.mxu0 %v2462_v32  ;;  %v2156_v32 = vld [vmem:[%s3054_s24 + $0xb0] sm:$0xf0]  ;;  %v2212_v8 = vld [vmem:[%s3054_s24 + $0x118] sm:$0xf0]  ;;  %v2218_v23 = vld [vmem:[%s3054_s24 + $0x120] sm:$0xf] }
  0x86   : > { %1156 = vmatpush.bf16.msra.mxu1 %v2470_v33  ;;  %v2162_v33 = vld [vmem:[%s3054_s24 + $0xa8] sm:$0xf]  ;;  %v2159_v38 = vor.u32 %v2514_v31, %v2156_v32  ;;  %v452_v21 = vld [vmem:[#allocation2 + $0xb0] sm:$0xff]  ;;  %v2533_v29 = vld [vmem:[%s3054_s24 + $0x134] sm:$0xf0] }
  0x87   : > { %1245 = vmatpush.bf16.msra.mxu2 %v2478_v34  ;;  %v2517_v34 = vld [vmem:[%s3054_s24 + $0xb4] sm:$0xf0]  ;;  %v2532_v24 = vld [vmem:[%s3054_s24 + $0x12c] sm:$0xf0]  ;;  %v2531_v30 = vld [vmem:[%s3054_s24 + $0x12c] sm:$0xf] }
  0x88   : > { %1334 = vmatpush.bf16.msra.mxu3 %v2486_v35  ;;  %1068 = vmatmul.bf16.vlgmr.msra.gmra.mxu0 %v2075_v41  ;;  %v2515_v35 = vld [vmem:[%s3054_s24 + $0xac] sm:$0xf]  ;;  %v2163_v39 = vor.u32 %v2517_v34, %v2162_v33  ;;  %v2170_v41 = vld [vmem:[%s3054_s24 + $0xc0] sm:$0xf]  ;;  %v2228_v31 = vld [vmem:[%s3054_s24 + $0x138] sm:$0xf0] }
  0x89   : > { %1157 = vmatmul.bf16.vlgmr.msra.gmra.mxu1 %v2079_v42  ;;  %v2167_v40 = vor.u32 %v2515_v35, %v2164_v36  ;;  %v2520_v42 = vld [vmem:[%s3054_s24 + $0xcc] sm:$0xf0]  ;;  %v2219_v35 = vor.u32 %v2532_v24, %v2218_v23  ;;  %v2236_v57 = vld [vmem:[%s3054_s24 + $0x150] sm:$0xf0]  ;;  %v2242_v58 = vld [vmem:[%s3054_s24 + $0x148] sm:$0xf] }
  0x8a   : > { %1246 = vmatmul.bf16.vlgmr.msra.gmra.mxu2 %v2083_v43  ;;  %v2518_v43 = vld [vmem:[%s3054_s24 + $0xc4] sm:$0xf]  ;;  %v2171_v49 = vor.u32 %v2520_v42, %v2170_v41  ;;  %v2231_v41 = vor.u32 %v2531_v30, %v2228_v31  ;;  %v2537_v59 = vld [vmem:[%s3054_s24 + $0x154] sm:$0xf0]  ;;  %v2535_v60 = vld [vmem:[%s3054_s24 + $0x14c] sm:$0xf] }
  0x8b   : > { %1335 = vmatmul.bf16.vlgmr.msra.gmra.mxu3 %v2087_v44  ;;  %v2172_v44 = vld [vmem:[%s3054_s24 + $0xd0] sm:$0xf0]  ;;  %v453_v42 = vld [vmem:[#allocation2] sm:$0xff]  ;;  %v2258_v24 = vld [vmem:[%s3054_s24 + $0x168] sm:$0xf] }
  0x8c   : > { %v2175_v50 = vor.u32 %v2518_v43, %v2172_v44  ;;  %v2252_v23 = vld [vmem:[%s3054_s24 + $0x170] sm:$0xf0] }
  0x98   : > { %1073 = vmatmul.bf16.gmra.mxu0 %v2091_v53  ;;  %v2186_v53 = vld [vmem:[%s3054_s24 + $0xe0] sm:$0xf] }
  0x99   : > { %1162 = vmatmul.bf16.gmra.mxu1 %v2095_v54  ;;  %v2524_v54 = vld [vmem:[%s3054_s24 + $0xec] sm:$0xf0] }
  0x9a   : > { %1251 = vmatmul.bf16.gmra.mxu2 %v2099_v55  ;;  %v2522_v55 = vld [vmem:[%s3054_s24 + $0xe4] sm:$0xf]  ;;  %v2187_v61 = vor.u32 %v2524_v54, %v2186_v53  ;;  %v2234_v53 = vld [vmem:[%s3054_s24 + $0x140] sm:$0xf]  ;;  %v2536_v54 = vld [vmem:[%s3054_s24 + $0x14c] sm:$0xf0] }
  0x9b   : > { %1340 = vmatmul.bf16.gmra.mxu3 %v2103_v56  ;;  %v2188_v56 = vld [vmem:[%s3054_s24 + $0xf0] sm:$0xf0] }
  0x9c   : > { %v2191_v62 = vor.u32 %v2522_v55, %v2188_v56  ;;  %v2534_v56 = vld [vmem:[%s3054_s24 + $0x144] sm:$0xf] }
  0xa8   : > { %1078 = vmatmul.bf16.gmra.mxu0 %v2107_v1  ;;  %v2202_v1 = vld [vmem:[%s3054_s24 + $0x100] sm:$0xf] }
  0xa9   : > { %1167 = vmatmul.bf16.gmra.mxu1 %v2111_v2  ;;  %v2528_v2 = vld [vmem:[%s3054_s24 + $0x10c] sm:$0xf0] }
  0xaa   : > { %1256 = vmatmul.bf16.gmra.mxu2 %v2115_v3  ;;  %v2526_v3 = vld [vmem:[%s3054_s24 + $0x104] sm:$0xf]  ;;  %v2203_v9 = vor.u32 %v2528_v2, %v2202_v1  ;;  %v2235_v1 = vor.u32 %v2536_v54, %v2234_v53  ;;  %v2239_v2 = vor.u32 %v2534_v56, %v2236_v57  ;;  %v2268_v53 = vld [vmem:[%s3054_s24 + $0x190] sm:$0xf0]  ;;  %v2274_v54 = vld [vmem:[%s3054_s24 + $0x188] sm:$0xf] }
  0xab   : > { %1345 = vmatmul.bf16.gmra.mxu3 %v2119_v4  ;;  %v2204_v4 = vld [vmem:[%s3054_s24 + $0x110] sm:$0xf0]  ;;  %v2543_v56 = vld [vmem:[%s3054_s24 + $0x18c] sm:$0xf]  ;;  %v2276_v57 = vld [vmem:[%s3054_s24 + $0x198] sm:$0xf0] }
  0xac   : > { %v2207_v10 = vor.u32 %v2526_v3, %v2204_v4 }
  0xb8   : > { %1083 = vmatmul.bf16.gmra.mxu0 %v2123_v13  ;;  %v2211_v13 = vor.u32 %v2529_v6, %v2210_v5  ;;  %v2243_v6 = vor.u32 %v2537_v59, %v2242_v58 }
  0xb9   : > { %1172 = vmatmul.bf16.gmra.mxu1 %v2127_v14  ;;  %v2215_v14 = vor.u32 %v2527_v7, %v2212_v8  ;;  %v455_v8 = vld [vmem:[#allocation2 + $0x18] sm:$0xff] }
  0xba   : > { %1261 = vmatmul.bf16.gmra.mxu2 %v2131_v15 }
  0xbb   : > { %1350 = vmatmul.bf16.gmra.mxu3 %v2135_v16 }
  0xc8   : > { %1088 = vmatmul.bf16.gmra.mxu0 %v2139_v25 }
  0xc9   : > { %1177 = vmatmul.bf16.gmra.mxu1 %v2143_v26  ;;  %v2530_v26 = vld [vmem:[%s3054_s24 + $0x124] sm:$0xf] }
  0xca   : > { %1266 = vmatmul.bf16.gmra.mxu2 %v2147_v27  ;;  %v2220_v27 = vld [vmem:[%s3054_s24 + $0x130] sm:$0xf0] }
  0xcb   : > { %1355 = vmatmul.bf16.gmra.mxu3 %v2151_v28  ;;  %v2226_v28 = vld [vmem:[%s3054_s24 + $0x128] sm:$0xf]  ;;  %v2223_v36 = vor.u32 %v2530_v26, %v2220_v27  ;;  %v2539_v26 = vld [vmem:[%s3054_s24 + $0x16c] sm:$0xf]  ;;  %v2260_v27 = vld [vmem:[%s3054_s24 + $0x178] sm:$0xf0] }
  0xd8   : > { %1093 = vmatmul.bf16.gmra.mxu0 %v2155_v37 }
  0xd9   : > { %1182 = vmatmul.bf16.gmra.mxu1 %v2159_v38 }
  0xda   : > { %1271 = vmatmul.bf16.gmra.mxu2 %v2163_v39 }
  0xdb   : > { %1360 = vmatmul.bf16.gmra.mxu3 %v2167_v40  ;;  %v2227_v40 = vor.u32 %v2533_v29, %v2226_v28 }
  0xe8   : > { %1098 = vmatmul.bf16.gmra.mxu0 %v2171_v49 }
  0xe9   : > { %1187 = vmatmul.bf16.gmra.mxu1 %v2175_v50 }
  0xea   : > { %1276 = vmatmul.bf16.gmra.mxu2 %v2179_v51  ;;  %v454_v51 = vld [vmem:[#allocation2 + $0xd8] sm:$0xff] }
  0xeb   : > { %1365 = vmatmul.bf16.gmra.mxu3 %v2183_v52 }
  0xf8   : > { %1103 = vmatmul.bf16.gmra.mxu0 %v2187_v61  ;;  %v2244_v61 = vld [vmem:[%s3054_s24 + $0x158] sm:$0xf0] }
  0xf9   : > { %1192 = vmatmul.bf16.gmra.mxu1 %v2191_v62  ;;  %v2247_v7 = vor.u32 %v2535_v60, %v2244_v61 }
  0xfa   : > { %1281 = vmatmul.bf16.gmra.mxu2 %v2195_v63 }
  0xfb   : > { %1370 = vmatmul.bf16.gmra.mxu3 %v2199_v0 }
 0x105   : > { %v1069_v11 = vpop.f32.mrf.mxu0 }
 0x106   : > { %v1158_v12 = vpop.f32.mrf.mxu1 }
 0x107   : > { %v1159_v15 = vadd.f32 %v1158_v12, %v1069_v11 }
 0x108   : > { %1108 = vmatmul.bf16.gmra.mxu0 %v2203_v9 }
 0x109   : > { %1197 = vmatmul.bf16.gmra.mxu1 %v2207_v10 }
 0x10a   : > { %1286 = vmatmul.bf16.gmra.mxu2 %v2211_v13 }
 0x10b   : > { %1375 = vmatmul.bf16.gmra.mxu3 %v2215_v14 }
 0x10d   : > { %v1247_v16 = vpop.f32.mrf.mxu2  ;;  %v1071_v19 = vpop.f32.mrf.mxu0 }
 0x10e   : > { %v1336_v17 = vpop.f32.mrf.mxu3  ;;  %v1248_v18 = vadd.f32 %v1247_v16, %v1159_v15  ;;  %v1160_v20 = vpop.f32.mrf.mxu1 }
 0x10f   : > { %v1161_v32 = vadd.f32 %v1160_v20, %v1071_v19  ;;  %v2250_v19 = vld [vmem:[%s3054_s24 + $0x160] sm:$0xf]  ;;  %v2540_v20 = vld [vmem:[%s3054_s24 + $0x16c] sm:$0xf0] }
 0x110   : > { %v1337_v22 = vadd.f32 %v1336_v17, %v1248_v18  ;;  %v456_v17 = vld [vmem:[#allocation2 + $0x50] sm:$0xff]  ;;  %v2251_v31 = vor.u32 %v2540_v20, %v2250_v19  ;;  %v2290_v20 = vld [vmem:[%s3054_s24 + $0x1a8] sm:$0xf] }
 0x111   : > { %v2284_v19 = vld [vmem:[%s3054_s24 + $0x1b0] sm:$0xf0] }
 0x112   : > { %v1416_v25 = vadd.f32 %v1337_v22, %v452_v21  ;;  %v2538_v22 = vld [vmem:[%s3054_s24 + $0x164] sm:$0xf] }
 0x114   : > { %1448 = vst [vmem:[#allocation2 + $0xb0] sm:$0xff] %v1416_v25  ;;  %v2541_v25 = vld [vmem:[%s3054_s24 + $0x174] sm:$0xf0] }
 0x115   : > { %v1249_v33 = vpop.f32.mrf.mxu2  ;;  %v1074_v38 = vpop.f32.mrf.mxu0 }
 0x116   : > { %v1338_v34 = vpop.f32.mrf.mxu3  ;;  %v1250_v37 = vadd.f32 %v1249_v33, %v1161_v32  ;;  %v1163_v39 = vpop.f32.mrf.mxu1  ;;  %v2255_v32 = vor.u32 %v2538_v22, %v2252_v23  ;;  %v2547_v22 = vld [vmem:[%s3054_s24 + $0x1ac] sm:$0xf]  ;;  %v2292_v23 = vld [vmem:[%s3054_s24 + $0x1b8] sm:$0xf0] }
 0x117   : > { %v1164_v45 = vadd.f32 %v1163_v39, %v1074_v38  ;;  %v457_v38 = vld [vmem:[#allocation2 + $0x68] sm:$0xff] }
 0x118   : > { %v1339_v43 = vadd.f32 %v1338_v34, %v1250_v37  ;;  %1113 = vmatmul.bf16.gmra.mxu0 %v2219_v35  ;;  %v2263_v37 = vor.u32 %v2539_v26, %v2260_v27 }
 0x119   : > { %1202 = vmatmul.bf16.gmra.mxu1 %v2223_v36  ;;  %v2259_v36 = vor.u32 %v2541_v25, %v2258_v24 }
 0x11a   : > { %v1417_v44 = vadd.f32 %v1339_v43, %v453_v42  ;;  %1291 = vmatmul.bf16.gmra.mxu2 %v2227_v40 }
 0x11b   : > { %1380 = vmatmul.bf16.gmra.mxu3 %v2231_v41 }
 0x11c   : > { %1449 = vst [vmem:[#allocation2] sm:$0xff] %v1417_v44 }
 0x11d   : > { %v1252_v46 = vpop.f32.mrf.mxu2  ;;  %v1076_v49 = vpop.f32.mrf.mxu0 }
 0x11e   : > { %v1341_v47 = vpop.f32.mrf.mxu3  ;;  %v1253_v48 = vadd.f32 %v1252_v46, %v1164_v45  ;;  %v1165_v50 = vpop.f32.mrf.mxu1 }
 0x11f   : > { %v1166_v62 = vadd.f32 %v1165_v50, %v1076_v49  ;;  %v2266_v49 = vld [vmem:[%s3054_s24 + $0x180] sm:$0xf]  ;;  %v2544_v50 = vld [vmem:[%s3054_s24 + $0x18c] sm:$0xf0] }
 0x120   : > { %v1342_v52 = vadd.f32 %v1341_v47, %v1253_v48  ;;  %v458_v47 = vld [vmem:[#allocation2 + $0x30] sm:$0xff]  ;;  %v2267_v61 = vor.u32 %v2544_v50, %v2266_v49  ;;  %v2306_v50 = vld [vmem:[%s3054_s24 + $0x1c8] sm:$0xf] }
 0x121   : > { %v2300_v49 = vld [vmem:[%s3054_s24 + $0x1d0] sm:$0xf0] }
 0x122   : > { %v1418_v55 = vadd.f32 %v1342_v52, %v454_v51  ;;  %v2542_v52 = vld [vmem:[%s3054_s24 + $0x184] sm:$0xf] }
 0x124   : > { %1450 = vst [vmem:[#allocation2 + $0xd8] sm:$0xff] %v1418_v55  ;;  %v2545_v55 = vld [vmem:[%s3054_s24 + $0x194] sm:$0xf0] }
 0x125   : > { %v1254_v63 = vpop.f32.mrf.mxu2  ;;  %v1079_v4 = vpop.f32.mrf.mxu0 }
 0x126   : > { %v1343_v0 = vpop.f32.mrf.mxu3  ;;  %v1255_v3 = vadd.f32 %v1254_v63, %v1166_v62  ;;  %v1168_v5 = vpop.f32.mrf.mxu1  ;;  %v2271_v62 = vor.u32 %v2542_v52, %v2268_v53  ;;  %v2551_v52 = vld [vmem:[%s3054_s24 + $0x1cc] sm:$0xf]  ;;  %v2308_v53 = vld [vmem:[%s3054_s24 + $0x1d8] sm:$0xf0] }
 0x127   : > { %v1169_v11 = vadd.f32 %v1168_v5, %v1079_v4  ;;  %v459_v4 = vld [vmem:[#allocation2 + $0x48] sm:$0xff] }
 0x128   : > { %v1344_v9 = vadd.f32 %v1343_v0, %v1255_v3  ;;  %1118 = vmatmul.bf16.gmra.mxu0 %v2235_v1  ;;  %v2279_v3 = vor.u32 %v2543_v56, %v2276_v57 }
 0x129   : > { %1207 = vmatmul.bf16.gmra.mxu1 %v2239_v2  ;;  %v2275_v2 = vor.u32 %v2545_v55, %v2274_v54 }
 0x12a   : > { %v1419_v10 = vadd.f32 %v1344_v9, %v455_v8  ;;  %1296 = vmatmul.bf16.gmra.mxu2 %v2243_v6 }
 0x12b   : > { %1385 = vmatmul.bf16.gmra.mxu3 %v2247_v7 }
 0x12c   : > { %1451 = vst [vmem:[#allocation2 + $0x18] sm:$0xff] %v1419_v10 }
 0x12d   : > { %v1257_v12 = vpop.f32.mrf.mxu2  ;;  %v1081_v15 = vpop.f32.mrf.mxu0 }
 0x12e   : > { %v1346_v13 = vpop.f32.mrf.mxu3  ;;  %v1258_v14 = vadd.f32 %v1257_v12, %v1169_v11  ;;  %v1170_v16 = vpop.f32.mrf.mxu1 }
 0x12f   : > { %v1171_v28 = vadd.f32 %v1170_v16, %v1081_v15  ;;  %v2282_v15 = vld [vmem:[%s3054_s24 + $0x1a0] sm:$0xf]  ;;  %v2548_v16 = vld [vmem:[%s3054_s24 + $0x1ac] sm:$0xf0] }
 0x130   : > { %v1347_v18 = vadd.f32 %v1346_v13, %v1258_v14  ;;  %v460_v13 = vld [vmem:[#allocation2 + $0x80] sm:$0xff]  ;;  %v2283_v27 = vor.u32 %v2548_v16, %v2282_v15  ;;  %v2316_v15 = vld [vmem:[%s3054_s24 + $0x1f0] sm:$0xf0]  ;;  %v2322_v16 = vld [vmem:[%s3054_s24 + $0x1e8] sm:$0xf] }
 0x132   : > { %v1420_v21 = vadd.f32 %v1347_v18, %v456_v17  ;;  %v2546_v18 = vld [vmem:[%s3054_s24 + $0x1a4] sm:$0xf] }
 0x134   : > { %1452 = vst [vmem:[#allocation2 + $0x50] sm:$0xff] %v1420_v21  ;;  %v2549_v21 = vld [vmem:[%s3054_s24 + $0x1b4] sm:$0xf0] }
 0x135   : > { %v1259_v29 = vpop.f32.mrf.mxu2  ;;  %v1084_v34 = vpop.f32.mrf.mxu0 }
 0x136   : > { %v1348_v30 = vpop.f32.mrf.mxu3  ;;  %v1260_v33 = vadd.f32 %v1259_v29, %v1171_v28  ;;  %v1173_v35 = vpop.f32.mrf.mxu1  ;;  %v2287_v28 = vor.u32 %v2546_v18, %v2284_v19  ;;  %v2555_v18 = vld [vmem:[%s3054_s24 + $0x1ec] sm:$0xf]  ;;  %v2324_v19 = vld [vmem:[%s3054_s24 + $0x1f8] sm:$0xf0] }
 0x137   : > { %v1174_v41 = vadd.f32 %v1173_v35, %v1084_v34  ;;  %v461_v34 = vld [vmem:[#allocation2 + $0x88] sm:$0xff] }
 0x138   : > { %v1349_v39 = vadd.f32 %v1348_v30, %v1260_v33  ;;  %1123 = vmatmul.bf16.gmra.mxu0 %v2251_v31  ;;  %v2295_v33 = vor.u32 %v2547_v22, %v2292_v23 }
 0x139   : > { %1212 = vmatmul.bf16.gmra.mxu1 %v2255_v32  ;;  %v2291_v32 = vor.u32 %v2549_v21, %v2290_v20 }
 0x13a   : > { %v1421_v40 = vadd.f32 %v1349_v39, %v457_v38  ;;  %1301 = vmatmul.bf16.gmra.mxu2 %v2259_v36 }
 0x13b   : > { %1390 = vmatmul.bf16.gmra.mxu3 %v2263_v37 }
 0x13c   : > { %1453 = vst [vmem:[#allocation2 + $0x68] sm:$0xff] %v1421_v40 }
 0x13d   : > { %v1262_v42 = vpop.f32.mrf.mxu2  ;;  %v1086_v45 = vpop.f32.mrf.mxu0 }
 0x13e   : > { %v1351_v43 = vpop.f32.mrf.mxu3  ;;  %v1263_v44 = vadd.f32 %v1262_v42, %v1174_v41  ;;  %v1175_v46 = vpop.f32.mrf.mxu1 }
 0x13f   : > { %v1176_v58 = vadd.f32 %v1175_v46, %v1086_v45  ;;  %v2298_v45 = vld [vmem:[%s3054_s24 + $0x1c0] sm:$0xf]  ;;  %v2552_v46 = vld [vmem:[%s3054_s24 + $0x1cc] sm:$0xf0] }
 0x140   : > { %v1352_v48 = vadd.f32 %v1351_v43, %v1263_v44  ;;  %v462_v43 = vld [vmem:[#allocation2 + $0xe8] sm:$0xff]  ;;  %v2299_v57 = vor.u32 %v2552_v46, %v2298_v45 }
 0x142   : > { %v1422_v51 = vadd.f32 %v1352_v48, %v458_v47  ;;  %v2550_v48 = vld [vmem:[%s3054_s24 + $0x1c4] sm:$0xf] }
 0x144   : > { %1454 = vst [vmem:[#allocation2 + $0x30] sm:$0xff] %v1422_v51  ;;  %v2553_v51 = vld [vmem:[%s3054_s24 + $0x1d4] sm:$0xf0] }
 0x145   : > { %v1264_v59 = vpop.f32.mrf.mxu2  ;;  %v1089_v0 = vpop.f32.mrf.mxu0 }
 0x146   : > { %v1353_v60 = vpop.f32.mrf.mxu3  ;;  %v1265_v63 = vadd.f32 %v1264_v59, %v1176_v58  ;;  %v1178_v1 = vpop.f32.mrf.mxu1  ;;  %v2303_v58 = vor.u32 %v2550_v48, %v2300_v49  ;;  %v467_v48 = vld [vmem:[#allocation2 + $0x78] sm:$0xff] }
 0x147   : > { %v1179_v7 = vadd.f32 %v1178_v1, %v1089_v0  ;;  %v463_v0 = vld [vmem:[#allocation2 + $0xb8] sm:$0xff] }
 0x148   : > { %v1354_v5 = vadd.f32 %v1353_v60, %v1265_v63  ;;  %1128 = vmatmul.bf16.gmra.mxu0 %v2267_v61  ;;  %v2311_v63 = vor.u32 %v2551_v52, %v2308_v53 }
 0x149   : > { %1217 = vmatmul.bf16.gmra.mxu1 %v2271_v62  ;;  %v2307_v62 = vor.u32 %v2553_v51, %v2306_v50 }
 0x14a   : > { %v1423_v6 = vadd.f32 %v1354_v5, %v459_v4  ;;  %1306 = vmatmul.bf16.gmra.mxu2 %v2275_v2 }
 0x14b   : > { %1395 = vmatmul.bf16.gmra.mxu3 %v2279_v3 }
 0x14c   : > { %1455 = vst [vmem:[#allocation2 + $0x48] sm:$0xff] %v1423_v6 }
 0x14d   : > { %v1267_v8 = vpop.f32.mrf.mxu2  ;;  %v1091_v11 = vpop.f32.mrf.mxu0 }
 0x14e   : > { %v1356_v9 = vpop.f32.mrf.mxu3  ;;  %v1268_v10 = vadd.f32 %v1267_v8, %v1179_v7  ;;  %v1180_v12 = vpop.f32.mrf.mxu1 }
 0x14f   : > { %v1181_v24 = vadd.f32 %v1180_v12, %v1091_v11  ;;  %v2314_v11 = vld [vmem:[%s3054_s24 + $0x1e0] sm:$0xf]  ;;  %v2556_v12 = vld [vmem:[%s3054_s24 + $0x1ec] sm:$0xf0] }
 0x150   : > { %v1357_v14 = vadd.f32 %v1356_v9, %v1268_v10  ;;  %v464_v9 = vld [vmem:[#allocation2 + $0x60] sm:$0xff]  ;;  %v2315_v23 = vor.u32 %v2556_v12, %v2314_v11 }
 0x151   : > { %v470_v11 = vld [vmem:[#allocation2 + $0x40] sm:$0xff] }
 0x152   : > { %v1424_v17 = vadd.f32 %v1357_v14, %v460_v13  ;;  %v2554_v14 = vld [vmem:[%s3054_s24 + $0x1e4] sm:$0xf] }
 0x154   : > { %1456 = vst [vmem:[#allocation2 + $0x80] sm:$0xff] %v1424_v17  ;;  %v2557_v17 = vld [vmem:[%s3054_s24 + $0x1f4] sm:$0xf0] }
 0x155   : > { %v1269_v25 = vpop.f32.mrf.mxu2  ;;  %v1094_v30 = vpop.f32.mrf.mxu0 }
 0x156   : > { %v1358_v26 = vpop.f32.mrf.mxu3  ;;  %v1270_v29 = vadd.f32 %v1269_v25, %v1181_v24  ;;  %v1183_v31 = vpop.f32.mrf.mxu1  ;;  %v2319_v24 = vor.u32 %v2554_v14, %v2316_v15 }
 0x157   : > { %v1184_v37 = vadd.f32 %v1183_v31, %v1094_v30  ;;  %v465_v30 = vld [vmem:[#allocation2 + $0xf0] sm:$0xff] }
 0x158   : > { %v1359_v35 = vadd.f32 %v1358_v26, %v1270_v29  ;;  %1133 = vmatmul.bf16.gmra.mxu0 %v2283_v27  ;;  %v2327_v29 = vor.u32 %v2555_v18, %v2324_v19 }
 0x159   : > { %1222 = vmatmul.bf16.gmra.mxu1 %v2287_v28  ;;  %v2323_v28 = vor.u32 %v2557_v17, %v2322_v16 }
 0x15a   : > { %v1425_v36 = vadd.f32 %v1359_v35, %v461_v34  ;;  %1311 = vmatmul.bf16.gmra.mxu2 %v2291_v32 }
 0x15b   : > { %1400 = vmatmul.bf16.gmra.mxu3 %v2295_v33 }
 0x15c   : > { %1457 = vst [vmem:[#allocation2 + $0x88] sm:$0xff] %v1425_v36 }
 0x15d   : > { %v1272_v38 = vpop.f32.mrf.mxu2  ;;  %v1096_v41 = vpop.f32.mrf.mxu0 }
 0x15e   : > { %v1361_v39 = vpop.f32.mrf.mxu3  ;;  %v1273_v40 = vadd.f32 %v1272_v38, %v1184_v37  ;;  %v1185_v42 = vpop.f32.mrf.mxu1 }
 0x15f   : > { %v1186_v54 = vadd.f32 %v1185_v42, %v1096_v41 }
 0x160   : > { %v1362_v44 = vadd.f32 %v1361_v39, %v1273_v40  ;;  %v466_v39 = vld [vmem:[#allocation2 + $0x8] sm:$0xff] }
 0x162   : > { %v1426_v47 = vadd.f32 %v1362_v44, %v462_v43 }
 0x164   : > { %1458 = vst [vmem:[#allocation2 + $0xe8] sm:$0xff] %v1426_v47 }
 0x165   : > { %v1274_v55 = vpop.f32.mrf.mxu2  ;;  %v1099_v60 = vpop.f32.mrf.mxu0 }
 0x166   : > { %v1363_v56 = vpop.f32.mrf.mxu3  ;;  %v1275_v59 = vadd.f32 %v1274_v55, %v1186_v54  ;;  %v1188_v61 = vpop.f32.mrf.mxu1 }
 0x167   : > { %v1189_v3 = vadd.f32 %v1188_v61, %v1099_v60 }
 0x168   : > { %v1364_v1 = vadd.f32 %v1363_v56, %v1275_v59  ;;  %1138 = vmatmul.bf16.gmra.mxu0 %v2299_v57  ;;  %v468_v57 = vld [vmem:[#allocation2 + $0x38] sm:$0xff] }
 0x169   : > { %1227 = vmatmul.bf16.gmra.mxu1 %v2303_v58 }
 0x16a   : > { %v1427_v2 = vadd.f32 %v1364_v1, %v463_v0  ;;  %1316 = vmatmul.bf16.gmra.mxu2 %v2307_v62 }
 0x16b   : > { %1405 = vmatmul.bf16.gmra.mxu3 %v2311_v63 }
 0x16c   : > { %1459 = vst [vmem:[#allocation2 + $0xb8] sm:$0xff] %v1427_v2  ;;  %v469_v2 = vld [vmem:[#allocation2 + $0x58] sm:$0xff] }
 0x16d   : > { %v1277_v4 = vpop.f32.mrf.mxu2  ;;  %v1101_v7 = vpop.f32.mrf.mxu0 }
 0x16e   : > { %v1366_v5 = vpop.f32.mrf.mxu3  ;;  %v1278_v6 = vadd.f32 %v1277_v4, %v1189_v3  ;;  %v1190_v8 = vpop.f32.mrf.mxu1 }
 0x16f   : > { %v1191_v20 = vadd.f32 %v1190_v8, %v1101_v7 }
 0x170   : > { %v1367_v10 = vadd.f32 %v1366_v5, %v1278_v6 }
 0x172   : > { %v1428_v13 = vadd.f32 %v1367_v10, %v464_v9 }
 0x174   : > { %1460 = vst [vmem:[#allocation2 + $0x60] sm:$0xff] %v1428_v13 }
 0x175   : > { %v1279_v21 = vpop.f32.mrf.mxu2  ;;  %v1104_v26 = vpop.f32.mrf.mxu0 }
 0x176   : > { %v1368_v22 = vpop.f32.mrf.mxu3  ;;  %v1280_v25 = vadd.f32 %v1279_v21, %v1191_v20  ;;  %v1193_v27 = vpop.f32.mrf.mxu1  ;;  %v471_v20 = vld [vmem:[#allocation2 + $0xc8] sm:$0xff] }
 0x177   : > { %v1194_v33 = vadd.f32 %v1193_v27, %v1104_v26 }
 0x178   : > { %v1369_v31 = vadd.f32 %v1368_v22, %v1280_v25  ;;  %1143 = vmatmul.bf16.gmra.mxu0 %v2315_v23 }
 0x179   : > { %1232 = vmatmul.bf16.gmra.mxu1 %v2319_v24 }
 0x17a   : > { %v1429_v32 = vadd.f32 %v1369_v31, %v465_v30  ;;  %1321 = vmatmul.bf16.gmra.mxu2 %v2323_v28 }
 0x17b   : > { %1410 = vmatmul.bf16.gmra.mxu3 %v2327_v29  ;;  %v472_v29 = vld [vmem:[#allocation2 + $0xe0] sm:$0xff] }
 0x17c   : > { %1461 = vst [vmem:[#allocation2 + $0xf0] sm:$0xff] %v1429_v32 }
 0x17d   : > { %v1282_v34 = vpop.f32.mrf.mxu2  ;;  %v1106_v37 = vpop.f32.mrf.mxu0 }
 0x17e   : > { %v1371_v35 = vpop.f32.mrf.mxu3  ;;  %v1283_v36 = vadd.f32 %v1282_v34, %v1194_v33  ;;  %v1195_v38 = vpop.f32.mrf.mxu1 }
 0x17f   : > { %v1196_v42 = vadd.f32 %v1195_v38, %v1106_v37  ;;  %v473_v38 = vld [vmem:[#allocation2 + $0x90] sm:$0xff] }
 0x180   : > { %v1372_v40 = vadd.f32 %v1371_v35, %v1283_v36 }
 0x182   : > { %v1430_v41 = vadd.f32 %v1372_v40, %v466_v39 }
 0x184   : > { %1462 = vst [vmem:[#allocation2 + $0x8] sm:$0xff] %v1430_v41 }
 0x185   : > { %v1284_v43 = vpop.f32.mrf.mxu2  ;;  %v1109_v46 = vpop.f32.mrf.mxu0 }
 0x186   : > { %v1373_v44 = vpop.f32.mrf.mxu3  ;;  %v1285_v45 = vadd.f32 %v1284_v43, %v1196_v42  ;;  %v1198_v47 = vpop.f32.mrf.mxu1 }
 0x187   : > { %v1199_v51 = vadd.f32 %v1198_v47, %v1109_v46  ;;  %v474_v47 = vld [vmem:[#allocation2 + $0x70] sm:$0xff] }
 0x188   : > { %v1374_v49 = vadd.f32 %v1373_v44, %v1285_v45 }
 0x18a   : > { %v1431_v50 = vadd.f32 %v1374_v49, %v467_v48 }
 0x18c   : > { %1463 = vst [vmem:[#allocation2 + $0x78] sm:$0xff] %v1431_v50 }
 0x18d   : > { %v1287_v52 = vpop.f32.mrf.mxu2  ;;  %v1111_v55 = vpop.f32.mrf.mxu0 }
 0x18e   : > { %v1376_v53 = vpop.f32.mrf.mxu3  ;;  %v1288_v54 = vadd.f32 %v1287_v52, %v1199_v51  ;;  %v1200_v56 = vpop.f32.mrf.mxu1 }
 0x18f   : > { %v1201_v60 = vadd.f32 %v1200_v56, %v1111_v55  ;;  %v475_v56 = vld [vmem:[#allocation2 + $0xc0] sm:$0xff] }
 0x190   : > { %v1377_v58 = vadd.f32 %v1376_v53, %v1288_v54 }
 0x192   : > { %v1432_v59 = vadd.f32 %v1377_v58, %v468_v57 }
 0x194   : > { %1464 = vst [vmem:[#allocation2 + $0x38] sm:$0xff] %v1432_v59 }
 0x195   : > { %v1289_v61 = vpop.f32.mrf.mxu2  ;;  %v1114_v0 = vpop.f32.mrf.mxu0 }
 0x196   : > { %v1378_v62 = vpop.f32.mrf.mxu3  ;;  %v1290_v63 = vadd.f32 %v1289_v61, %v1201_v60  ;;  %v1203_v1 = vpop.f32.mrf.mxu1 }
 0x197   : > { %v1204_v5 = vadd.f32 %v1203_v1, %v1114_v0  ;;  %v476_v1 = vld [vmem:[#allocation2 + $0xa8] sm:$0xff] }
 0x198   : > { %v1379_v3 = vadd.f32 %v1378_v62, %v1290_v63 }
 0x19a   : > { %v1433_v4 = vadd.f32 %v1379_v3, %v469_v2 }
 0x19c   : > { %1465 = vst [vmem:[#allocation2 + $0x58] sm:$0xff] %v1433_v4 }
 0x19d   : > { %v1292_v6 = vpop.f32.mrf.mxu2  ;;  %v1116_v9 = vpop.f32.mrf.mxu0 }
 0x19e   : > { %v1381_v7 = vpop.f32.mrf.mxu3  ;;  %v1293_v8 = vadd.f32 %v1292_v6, %v1204_v5  ;;  %v1205_v10 = vpop.f32.mrf.mxu1 }
 0x19f   : > { %v1206_v14 = vadd.f32 %v1205_v10, %v1116_v9  ;;  %v477_v10 = vld [vmem:[#allocation2 + $0xd0] sm:$0xff] }
 0x1a0   : > { %v1382_v12 = vadd.f32 %v1381_v7, %v1293_v8 }
 0x1a2   : > { %v1434_v13 = vadd.f32 %v1382_v12, %v470_v11 }
 0x1a4   : > { %1466 = vst [vmem:[#allocation2 + $0x40] sm:$0xff] %v1434_v13 }
 0x1a5   : > { %v1294_v15 = vpop.f32.mrf.mxu2  ;;  %v1119_v18 = vpop.f32.mrf.mxu0 }
 0x1a6   : > { %v1383_v16 = vpop.f32.mrf.mxu3  ;;  %v1295_v17 = vadd.f32 %v1294_v15, %v1206_v14  ;;  %v1208_v19 = vpop.f32.mrf.mxu1 }
 0x1a7   : > { %v1209_v23 = vadd.f32 %v1208_v19, %v1119_v18  ;;  %v478_v19 = vld [vmem:[#allocation2 + $0x10] sm:$0xff] }
 0x1a8   : > { %v1384_v21 = vadd.f32 %v1383_v16, %v1295_v17 }
 0x1aa   : > { %v1435_v22 = vadd.f32 %v1384_v21, %v471_v20 }
 0x1ac   : > { %1467 = vst [vmem:[#allocation2 + $0xc8] sm:$0xff] %v1435_v22 }
 0x1ad   : > { %v1297_v24 = vpop.f32.mrf.mxu2  ;;  %v1121_v27 = vpop.f32.mrf.mxu0 }
 0x1ae   : > { %v1386_v25 = vpop.f32.mrf.mxu3  ;;  %v1298_v26 = vadd.f32 %v1297_v24, %v1209_v23  ;;  %v1210_v28 = vpop.f32.mrf.mxu1 }
 0x1af   : > { %v1211_v32 = vadd.f32 %v1210_v28, %v1121_v27  ;;  %v479_v28 = vld [vmem:[#allocation2 + $0x28] sm:$0xff] }
 0x1b0   : > { %v1387_v30 = vadd.f32 %v1386_v25, %v1298_v26 }
 0x1b2   : > { %v1436_v31 = vadd.f32 %v1387_v30, %v472_v29 }
 0x1b4   : > { %1468 = vst [vmem:[#allocation2 + $0xe0] sm:$0xff] %v1436_v31 }
 0x1b5   : > { %v1299_v33 = vpop.f32.mrf.mxu2  ;;  %v1124_v36 = vpop.f32.mrf.mxu0 }
 0x1b6   : > { %v1388_v34 = vpop.f32.mrf.mxu3  ;;  %v1300_v35 = vadd.f32 %v1299_v33, %v1211_v32  ;;  %v1213_v37 = vpop.f32.mrf.mxu1 }
 0x1b7   : > { %v1214_v41 = vadd.f32 %v1213_v37, %v1124_v36  ;;  %v480_v37 = vld [vmem:[#allocation2 + $0xa0] sm:$0xff] }
 0x1b8   : > { %v1389_v39 = vadd.f32 %v1388_v34, %v1300_v35 }
 0x1ba   : > { %v1437_v40 = vadd.f32 %v1389_v39, %v473_v38 }
 0x1bc   : > { %1469 = vst [vmem:[#allocation2 + $0x90] sm:$0xff] %v1437_v40 }
 0x1bd   : > { %v1302_v42 = vpop.f32.mrf.mxu2  ;;  %v1126_v45 = vpop.f32.mrf.mxu0 }
 0x1be   : > { %v1391_v43 = vpop.f32.mrf.mxu3  ;;  %v1303_v44 = vadd.f32 %v1302_v42, %v1214_v41  ;;  %v1215_v46 = vpop.f32.mrf.mxu1 }
 0x1bf   : > { %v1216_v50 = vadd.f32 %v1215_v46, %v1126_v45 }
 0x1c0   : > { %v1392_v48 = vadd.f32 %v1391_v43, %v1303_v44  ;;  %v481_v44 = vld [vmem:[#allocation2 + $0xf8] sm:$0xff] }
 0x1c2   : > { %v1438_v49 = vadd.f32 %v1392_v48, %v474_v47 }
 0x1c4   : > { %1470 = vst [vmem:[#allocation2 + $0x70] sm:$0xff] %v1438_v49 }
 0x1c5   : > { %v1304_v51 = vpop.f32.mrf.mxu2  ;;  %v1129_v54 = vpop.f32.mrf.mxu0 }
 0x1c6   : > { %v1393_v52 = vpop.f32.mrf.mxu3  ;;  %v1305_v53 = vadd.f32 %v1304_v51, %v1216_v50  ;;  %v1218_v55 = vpop.f32.mrf.mxu1 }
 0x1c7   : > { %v1219_v59 = vadd.f32 %v1218_v55, %v1129_v54 }
 0x1c8   : > { %v1394_v57 = vadd.f32 %v1393_v52, %v1305_v53  ;;  %v482_v53 = vld [vmem:[#allocation2 + $0x20] sm:$0xff] }
 0x1ca   : > { %v1439_v58 = vadd.f32 %v1394_v57, %v475_v56 }
 0x1cc   : > { %1471 = vst [vmem:[#allocation2 + $0xc0] sm:$0xff] %v1439_v58 }
 0x1cd   : > { %v1307_v60 = vpop.f32.mrf.mxu2  ;;  %v1131_v63 = vpop.f32.mrf.mxu0 }
 0x1ce   : > { %v1396_v61 = vpop.f32.mrf.mxu3  ;;  %v1308_v62 = vadd.f32 %v1307_v60, %v1219_v59  ;;  %v1220_v0 = vpop.f32.mrf.mxu1 }
 0x1cf   : > { %v1221_v4 = vadd.f32 %v1220_v0, %v1131_v63 }
 0x1d0   : > { %v1397_v2 = vadd.f32 %v1396_v61, %v1308_v62  ;;  %v483_v61 = vld [vmem:[#allocation2 + $0x98] sm:$0xff] }
 0x1d2   : > { %v1440_v3 = vadd.f32 %v1397_v2, %v476_v1 }
 0x1d4   : > { %1472 = vst [vmem:[#allocation2 + $0xa8] sm:$0xff] %v1440_v3 }
 0x1d5   : > { %v1309_v5 = vpop.f32.mrf.mxu2  ;;  %v1134_v8 = vpop.f32.mrf.mxu0 }
 0x1d6   : > { %v1398_v6 = vpop.f32.mrf.mxu3  ;;  %v1310_v7 = vadd.f32 %v1309_v5, %v1221_v4  ;;  %v1223_v9 = vpop.f32.mrf.mxu1 }
 0x1d7   : > { %v1224_v13 = vadd.f32 %v1223_v9, %v1134_v8 }
 0x1d8   : > { %v1399_v11 = vadd.f32 %v1398_v6, %v1310_v7 }
 0x1da   : > { %v1441_v12 = vadd.f32 %v1399_v11, %v477_v10 }
 0x1dc   : > { %1473 = vst [vmem:[#allocation2 + $0xd0] sm:$0xff] %v1441_v12 }
 0x1dd   : > { %v1312_v14 = vpop.f32.mrf.mxu2  ;;  %v1136_v17 = vpop.f32.mrf.mxu0 }
 0x1de   : > { %v1401_v15 = vpop.f32.mrf.mxu3  ;;  %v1313_v16 = vadd.f32 %v1312_v14, %v1224_v13  ;;  %v1225_v18 = vpop.f32.mrf.mxu1 }
 0x1df   : > { %v1226_v22 = vadd.f32 %v1225_v18, %v1136_v17 }
 0x1e0   : > { %v1402_v20 = vadd.f32 %v1401_v15, %v1313_v16 }
 0x1e2   : > { %v1442_v21 = vadd.f32 %v1402_v20, %v478_v19 }
 0x1e4   : > { %1474 = vst [vmem:[#allocation2 + $0x10] sm:$0xff] %v1442_v21 }
 0x1e5   : > { %v1314_v23 = vpop.f32.mrf.mxu2  ;;  %v1139_v26 = vpop.f32.mrf.mxu0 }
 0x1e6   : > { %v1403_v24 = vpop.f32.mrf.mxu3  ;;  %v1315_v25 = vadd.f32 %v1314_v23, %v1226_v22  ;;  %v1228_v27 = vpop.f32.mrf.mxu1 }
 0x1e7   : > { %v1229_v31 = vadd.f32 %v1228_v27, %v1139_v26 }
 0x1e8   : > { %v1404_v29 = vadd.f32 %v1403_v24, %v1315_v25 }
 0x1ea   : > { %v1443_v30 = vadd.f32 %v1404_v29, %v479_v28 }
 0x1ec   : > { %1475 = vst [vmem:[#allocation2 + $0x28] sm:$0xff] %v1443_v30 }
 0x1ed   : > { %v1317_v32 = vpop.f32.mrf.mxu2  ;;  %v1141_v35 = vpop.f32.mrf.mxu0 }
 0x1ee   : > { %v1406_v33 = vpop.f32.mrf.mxu3  ;;  %v1318_v34 = vadd.f32 %v1317_v32, %v1229_v31  ;;  %v1230_v36 = vpop.f32.mrf.mxu1 }
 0x1ef   : > { %v1231_v40 = vadd.f32 %v1230_v36, %v1141_v35 }
 0x1f0   : > { %v1407_v38 = vadd.f32 %v1406_v33, %v1318_v34 }
 0x1f2   : > { %v1444_v39 = vadd.f32 %v1407_v38, %v480_v37 }
 0x1f4   : > { %1476 = vst [vmem:[#allocation2 + $0xa0] sm:$0xff] %v1444_v39 }
 0x1f5   : > { %v1319_v41 = vpop.f32.mrf.mxu2  ;;  %v1144_v45 = vpop.f32.mrf.mxu0 }
 0x1f6   : > { %v1408_v42 = vpop.f32.mrf.mxu3  ;;  %v1320_v43 = vadd.f32 %v1319_v41, %v1231_v40  ;;  %v1233_v46 = vpop.f32.mrf.mxu1 }
 0x1f7   : > { %v1234_v49 = vadd.f32 %v1233_v46, %v1144_v45 }
 0x1f8   : > { %v1409_v47 = vadd.f32 %v1408_v42, %v1320_v43 }
 0x1fa   : > { %v1445_v48 = vadd.f32 %v1409_v47, %v481_v44 }
 0x1fc   : > { %1477 = vst [vmem:[#allocation2 + $0xf8] sm:$0xff] %v1445_v48 }
 0x1fd   : > { %v1322_v50 = vpop.f32.mrf.mxu2  ;;  %v1146_v55 = vpop.f32.mrf.mxu0 }
 0x1fe   : > { %v1411_v51 = vpop.f32.mrf.mxu3  ;;  %v1323_v52 = vadd.f32 %v1322_v50, %v1234_v49  ;;  %v1235_v56 = vpop.f32.mrf.mxu1 }
 0x1ff   : > { %v1236_v58 = vadd.f32 %v1235_v56, %v1146_v55 }
 0x200   : > { %v1412_v54 = vadd.f32 %v1411_v51, %v1323_v52 }
 0x202   : > { %v1446_v57 = vadd.f32 %v1412_v54, %v482_v53 }
 0x204   : > { %1478 = vst [vmem:[#allocation2 + $0x20] sm:$0xff] %v1446_v57 }
 0x205   : > { %v1324_v59 = vpop.f32.mrf.mxu2 }
 0x206   : > { %v1325_v60 = vadd.f32 %v1324_v59, %v1236_v58  ;;  %v1413_v62 = vpop.f32.mrf.mxu3 }
 0x208   : > { %v1414_v63 = vadd.f32 %v1413_v62, %v1325_v60 }
 0x20a   : > { %v1447_v0 = vadd.f32 %v1414_v63, %v483_v61 }
 0x20c   : > { %1479 = vst [vmem:[#allocation2 + $0x98] sm:$0xff] %v1447_v0 }
 0x20d PF: > { %v1532_v1 = vld [vmem:[%s3072_s26 + $0x88] sm:$0xff]  ;;  %v1531_v2 = vld [vmem:[%s3072_s26 + $0x80] sm:$0xff]  ;;  %v2878_v4 = vmov 0   ;;  %v1533_v8 = vld [vmem:[%s3072_s26 + $0x90] sm:$0xff]  ;;  %s2558_s21 = sshll.u32 %s2863_s13, 8  ;;  %s1949_s13 = sshll.u32 %s3075_s23, 4  ;;  %s1950_s13 = int_to_ptr.vmem [resolvable:$true] %s1949_s13 }
 0x20e   : > { %v1515_v3 = vld [vmem:[%s3072_s26] sm:$0xff]  ;;  %2707 = vset.pattern.permute.xlu2 %v2878_v4  ;;  %2706 = vset.pattern.permute.xlu1 %v2878_v4  ;;  %v1540_v5 = vld [vmem:[%s3072_s26 + $0xc8] sm:$0xff]  ;;  %v1525_v11 = vld [vmem:[%s3072_s26 + $0x50] sm:$0xff]  ;;  %s1948_s20 = scalar_lea.hbm %s3448_s7, %s2558_s21  ;;  %s1937_s14 = scalar_lea.sflag [#allocation8], %s314_s10 }
 0x20f   : > { %2705 = vset.pattern.permute.xlu0 %v2878_v4  ;;  %1634 = vperm.xlu2 %2707, %v1532_v1   ;;  %v1539_v6 = vld [vmem:[%s3072_s26 + $0xc0] sm:$0xff]  ;;  %v1516_v9 = vld [vmem:[%s3072_s26 + $0x8] sm:$0xff]  ;;  %v1541_v12 = vld [vmem:[%s3072_s26 + $0xd0] sm:$0xff]  ;;  %s1951_s19 = sshll.u32 %s1948_s20, 4  ;;  %s2783_s22 = scalar_lea.hbm %s3448_s7, 512  ;;  %s1952_s19 = int_to_ptr.hbm [resolvable:$true] %s1951_s19 }
 0x210   : > { %1629 = vperm.xlu0 %2705, %v1531_v2   ;;  %1549 = vperm.xlu1 %2706, %v1515_v3   ;;  %v1523_v7 = vld [vmem:[%s3072_s26 + $0x40] sm:$0xff]  ;;  %v1524_v10 = vld [vmem:[%s3072_s26 + $0x48] sm:$0xff]  ;;  %v1517_v13 = vld [vmem:[%s3072_s26 + $0x10] sm:$0xff]  ;;  %s2777_s8 = sshra.s32 %s1952_s19, 4  ;;  %s2778_s8 = int_to_ptr.hbm [resolvable:$true] %s2777_s8 }
 0x211   : > { %v1518_v14 = vld [vmem:[%s3072_s26 + $0x18] sm:$0xff]  ;;  %v1543_v17 = vld [vmem:[%s3072_s26 + $0xe0] sm:$0xff]  ;;  %v1536_v20 = vld [vmem:[%s3072_s26 + $0xa8] sm:$0xff]  ;;  %s2779_s12 = scalar_lea.hbm %s2778_s8, 256  ;;  %p2784_p11 = scmp.lt.s32.totalorder %s2778_s8, %s3448_s7 }
 0x212   : > { %v1534_v15 = vld [vmem:[%s3072_s26 + $0x98] sm:$0xff]  ;;  %v1535_v19 = vld [vmem:[%s3072_s26 + $0xa0] sm:$0xff]  ;;  %v1753_v24 = vld [vmem:[%s3446_s5 + $0x70] sm:$0xff]  ;;  %p2780_p7 = scmp.ne.s32.totalorder %s2778_s8, %s2779_s12  ;;  %p2785_p12 = scmp.lt.s32.totalorder %s2783_s22, %s2779_s12 }
 0x213   : > { %v1542_v16 = vld [vmem:[%s3072_s26 + $0xd8] sm:$0xff]  ;;  %v1519_v21 = vld [vmem:[%s3072_s26 + $0x20] sm:$0xff]  ;;  %v1752_v25 = vld [vmem:[%s3446_s5 + $0x68] sm:$0xff] }
 0x214   : > { %v1526_v18 = vld [vmem:[%s3072_s26 + $0x58] sm:$0xff]  ;;  %v1527_v22 = vld [vmem:[%s3072_s26 + $0x60] sm:$0xff]  ;;  %v1528_v26 = vld [vmem:[%s3072_s26 + $0x68] sm:$0xff]  ;;  %p2781_p4 = pnand %p2780_p7, %p3001_p10  ;;  %p2786_p0 = por %p2785_p12, %p2784_p11 }
 0x215   : > { %v1754_v23 = vld [vmem:[%s3446_s5 + $0x78] sm:$0xff]  ;;  %v1544_v27 = vld [vmem:[%s3072_s26 + $0xe8] sm:$0xff]  ;;  %v1751_v29 = vld [vmem:[%s3446_s5 + $0x60] sm:$0xff] }
 0x216   : > { %1759 = vmatpush.msra.mxu0 %v1754_v23  ;;  %2560 = vmatpush.msra.mxu2 %v1754_v23  ;;  %v1520_v28 = vld [vmem:[%s3072_s26 + $0x28] sm:$0xff]  ;;  %v1750_v30 = vld [vmem:[%s3446_s5 + $0x58] sm:$0xff]  ;;  %v1521_v31 = vld [vmem:[%s3072_s26 + $0x30] sm:$0xff]  ;;  %p2782_p9 = pneg %p2781_p4 }
 0x217   : > { %1674 = vperm.xlu2 %2707, %v1540_v5   ;;  %2559 = vmatpush.msra.mxu1 %v1754_v23  ;;  %v1749_v32 = vld [vmem:[%s3446_s5 + $0x50] sm:$0xff]  ;;  %v1748_v35 = vld [vmem:[%s3446_s5 + $0x48] sm:$0xff]  ;;  %v1747_v36 = vld [vmem:[%s3446_s5 + $0x40] sm:$0xff] }
 0x218   : > { %1669 = vperm.xlu0 %2705, %v1539_v6   ;;  %1589 = vperm.xlu1 %2706, %v1523_v7   ;;  %v1537_v33 = vld [vmem:[%s3072_s26 + $0xb0] sm:$0xff]  ;;  %v1746_v37 = vld [vmem:[%s3446_s5 + $0x38] sm:$0xff]  ;;  %v1744_v42 = vld [vmem:[%s3446_s5 + $0x28] sm:$0xff]  ;;  %p2787_p2 = pnand %p2786_p0, %p2782_p9 }
 0x219   : > { %2561 = vmatpush.msra.mxu3 %v1754_v23  ;;  %1760 = vmatpush.msra.mxu0 %v1753_v24  ;;  %v1545_v34 = vld [vmem:[%s3072_s26 + $0xf0] sm:$0xff]  ;;  %v1546_v38 = vld [vmem:[%s3072_s26 + $0xf8] sm:$0xff]  ;;  %v1743_v43 = vld [vmem:[%s3446_s5 + $0x20] sm:$0xff] }
 0x21a   : > { %2563 = vmatpush.msra.mxu2 %v1753_v24  ;;  %2562 = vmatpush.msra.mxu1 %v1753_v24  ;;  %v1529_v39 = vld [vmem:[%s3072_s26 + $0x70] sm:$0xff]  ;;  %v1538_v40 = vld [vmem:[%s3072_s26 + $0xb8] sm:$0xff]  ;;  %v1740_v48 = vld [vmem:[%s3446_s5 + $0x8] sm:$0xff] }
 0x21b   : > { %2564 = vmatpush.msra.mxu3 %v1753_v24  ;;  %1761 = vmatpush.msra.mxu0 %v1752_v25  ;;  %v1745_v41 = vld [vmem:[%s3446_s5 + $0x30] sm:$0xff]  ;;  %v1742_v44 = vld [vmem:[%s3446_s5 + $0x18] sm:$0xff]  ;;  %v1739_v49 = vld [vmem:[%s3446_s5] sm:$0xff] }
 0x21c   : > { %2566 = vmatpush.msra.mxu2 %v1752_v25  ;;  %2565 = vmatpush.msra.mxu1 %v1752_v25  ;;  %v1522_v45 = vld [vmem:[%s3072_s26 + $0x38] sm:$0xff]  ;;  %v1741_v47 = vld [vmem:[%s3446_s5 + $0x10] sm:$0xff]  ;;  %v1499_v52 = vld [vmem:[#allocation2 + $0x38] sm:$0xff] }
 0x21d   : > { %2567 = vmatpush.msra.mxu3 %v1752_v25  ;;  %1762 = vmatpush.msra.mxu0 %v1751_v29  ;;  %v1530_v46 = vld [vmem:[%s3072_s26 + $0x78] sm:$0xff]  ;;  %v1500_v59 = vld [vmem:[#allocation2 + $0x58] sm:$0xff]  ;;  %v1507_v60 = vld [vmem:[#allocation2 + $0xa8] sm:$0xff] }
 0x21e   : > { %2569 = vmatpush.msra.mxu2 %v1751_v29  ;;  %2568 = vmatpush.msra.mxu1 %v1751_v29  ;;  %v1483_v53 = vld [vmem:[#allocation2 + $0xb0] sm:$0xff]  ;;  %v1491_v61 = vld [vmem:[#allocation2 + $0x80] sm:$0xff]  ;;  %v1492_v5 = vld [vmem:[#allocation2 + $0x88] sm:$0xff] }
 0x21f   : > { %1639 = vperm.xlu2 %2707, %v1533_v8   ;;  %2570 = vmatpush.msra.mxu3 %v1751_v29  ;;  %v1484_v4 = vld [vmem:[#allocation2] sm:$0xff]  ;;  %v1508_v6 = vld [vmem:[#allocation2 + $0xd0] sm:$0xff]  ;;  %v1486_v23 = vld [vmem:[#allocation2 + $0x18] sm:$0xff] }
 0x220   : > { %1554 = vperm.xlu0 %2705, %v1516_v9   ;;  %1594 = vperm.xlu1 %2706, %v1524_v10   ;;  %v1501_v7 = vld [vmem:[#allocation2 + $0x40] sm:$0xff]  ;;  %v1502_v24 = vld [vmem:[#allocation2 + $0xc8] sm:$0xff] }
 0x221   : > { %1763 = vmatpush.msra.mxu0 %v1750_v30  ;;  %2572 = vmatpush.msra.mxu2 %v1750_v30  ;;  %v1510_v25 = vld [vmem:[#allocation2 + $0x28] sm:$0xff] }
 0x222   : > { %2571 = vmatpush.msra.mxu1 %v1750_v30  ;;  %2573 = vmatpush.msra.mxu3 %v1750_v30 }
 0x223   : > { %1764 = vmatpush.msra.mxu0 %v1749_v32  ;;  %2575 = vmatpush.msra.mxu2 %v1749_v32 }
 0x224   : > { %2574 = vmatpush.msra.mxu1 %v1749_v32  ;;  %2576 = vmatpush.msra.mxu3 %v1749_v32  ;;  %v1494_v32 = vld [vmem:[#allocation2 + $0xb8] sm:$0xff] }
 0x225   : > { %1765 = vmatpush.msra.mxu0 %v1748_v35  ;;  %2578 = vmatpush.msra.mxu2 %v1748_v35 }
 0x226   : > { %2577 = vmatpush.msra.mxu1 %v1748_v35  ;;  %2579 = vmatpush.msra.mxu3 %v1748_v35 }
 0x227   : > { %1599 = vperm.xlu2 %2707, %v1525_v11   ;;  %1766 = vmatpush.msra.mxu0 %v1747_v36 }
 0x228   : > { %1679 = vperm.xlu0 %2705, %v1541_v12   ;;  %1559 = vperm.xlu1 %2706, %v1517_v13  }
 0x229   : > { %2581 = vmatpush.msra.mxu2 %v1747_v36  ;;  %1767 = vmatpush.msra.mxu0 %v1746_v37 }
 0x22a   : > { %2580 = vmatpush.msra.mxu1 %v1747_v36  ;;  %2582 = vmatpush.msra.mxu3 %v1747_v36 }
 0x22b   : > { %2584 = vmatpush.msra.mxu2 %v1746_v37  ;;  %1768 = vmatpush.msra.mxu0 %v1745_v41 }
 0x22c   : > { %2583 = vmatpush.msra.mxu1 %v1746_v37  ;;  %2585 = vmatpush.msra.mxu3 %v1746_v37 }
 0x22d   : > { %2587 = vmatpush.msra.mxu2 %v1745_v41  ;;  %1769 = vmatpush.msra.mxu0 %v1744_v42 }
 0x22e   : > { %2586 = vmatpush.msra.mxu1 %v1745_v41  ;;  %2588 = vmatpush.msra.mxu3 %v1745_v41  ;;  %v1487_v41 = vld [vmem:[#allocation2 + $0x50] sm:$0xff] }
 0x22f   : > { %1564 = vperm.xlu2 %2707, %v1518_v14   ;;  %2590 = vmatpush.msra.mxu2 %v1744_v42 }
 0x230   : > { %1644 = vperm.xlu0 %2705, %v1534_v15   ;;  %1684 = vperm.xlu1 %2706, %v1542_v16   ;;  %v1493_v15 = vld [vmem:[#allocation2 + $0xe8] sm:$0xff]  ;;  %v1509_v16 = vld [vmem:[#allocation2 + $0x10] sm:$0xff] }
 0x231   : > { %1770 = vmatpush.msra.mxu0 %v1743_v43  ;;  %2593 = vmatpush.msra.mxu2 %v1743_v43 }
 0x232   : > { %2589 = vmatpush.msra.mxu1 %v1744_v42  ;;  %2591 = vmatpush.msra.mxu3 %v1744_v42  ;;  %v1495_v42 = vld [vmem:[#allocation2 + $0x60] sm:$0xff] }
 0x233   : > { %1771 = vmatpush.msra.mxu0 %v1742_v44  ;;  %2596 = vmatpush.msra.mxu2 %v1742_v44 }
 0x234   : > { %2592 = vmatpush.msra.mxu1 %v1743_v43  ;;  %2594 = vmatpush.msra.mxu3 %v1743_v43  ;;  %v1504_v43 = vld [vmem:[#allocation2 + $0x90] sm:$0xff] }
 0x235   : > { %1772 = vmatpush.msra.mxu0 %v1741_v47  ;;  %2599 = vmatpush.msra.mxu2 %v1741_v47 }
 0x236   : > { %2595 = vmatpush.msra.mxu1 %v1742_v44  ;;  %2597 = vmatpush.msra.mxu3 %v1742_v44 }
 0x237   : > { %1689 = vperm.xlu2 %2707, %v1543_v17   ;;  %1773 = vmatpush.msra.mxu0 %v1740_v48  ;;  %v1485_v17 = vld [vmem:[#allocation2 + $0xd8] sm:$0xff] }
 0x238   : > { %1604 = vperm.xlu0 %2705, %v1526_v18   ;;  %1649 = vperm.xlu1 %2706, %v1535_v19  }
 0x239   : > { %2602 = vmatpush.msra.mxu2 %v1740_v48  ;;  %1774 = vmatpush.msra.mxu0 %v1739_v49 }
 0x23a   : > { %2598 = vmatpush.msra.mxu1 %v1741_v47  ;;  %2600 = vmatpush.msra.mxu3 %v1741_v47 }
 0x23b   : > { %2605 = vmatpush.msra.mxu2 %v1739_v49 }
 0x23c   : > { %2601 = vmatpush.msra.mxu1 %v1740_v48  ;;  %2603 = vmatpush.msra.mxu3 %v1740_v48 }
 0x23e   : > { %2604 = vmatpush.msra.mxu1 %v1739_v49  ;;  %2606 = vmatpush.msra.mxu3 %v1739_v49 }
 0x23f   : > { %1654 = vperm.xlu2 %2707, %v1536_v20  }
 0x240   : > { %1569 = vperm.xlu0 %2705, %v1519_v21   ;;  %1609 = vperm.xlu1 %2706, %v1527_v22  }
 0x247   : > { %1614 = vperm.xlu2 %2707, %v1528_v26  }
 0x248   : > { %1694 = vperm.xlu0 %2705, %v1544_v27   ;;  %1574 = vperm.xlu1 %2706, %v1520_v28  }
 0x24f   : > { %1579 = vperm.xlu2 %2707, %v1521_v31  }
 0x250   : > { %1659 = vperm.xlu0 %2705, %v1537_v33   ;;  %1699 = vperm.xlu1 %2706, %v1545_v34   ;;  %v1503_v33 = vld [vmem:[#allocation2 + $0xe0] sm:$0xff] }
 0x251   : > { %v1511_v34 = vld [vmem:[#allocation2 + $0xa0] sm:$0xff] }
 0x257   : > { %1704 = vperm.xlu2 %2707, %v1546_v38  }
 0x258   : > { %1619 = vperm.xlu0 %2705, %v1529_v39   ;;  %1664 = vperm.xlu1 %2706, %v1538_v40  }
 0x260   : > { %1584 = vperm.xlu0 %2705, %v1522_v45   ;;  %1624 = vperm.xlu1 %2706, %v1530_v46  }
 0x269   : > { %v1635_v50 = vpop.permute.xlu2 %1634 }
 0x26a   : > { %v1724_v0 = vmul.f32 %v1635_v50, %v1500_v59  ;;  %v1496_v50 = vld [vmem:[#allocation2 + $0xf0] sm:$0xff] }
 0x26b   : > { %v1489_v59 = vld [vmem:[#allocation2 + $0x30] sm:$0xff] }
 0x271   : > { %v1675_v51 = vpop.permute.xlu2 %1674 }
 0x272   : > { %v1732_v12 = vmul.f32 %v1675_v51, %v1508_v6  ;;  %v1512_v51 = vld [vmem:[#allocation2 + $0xf8] sm:$0xff] }
 0x273   : > { %v1514_v6 = vld [vmem:[#allocation2 + $0x98] sm:$0xff] }
 0x279   : > { %v1640_v56 = vpop.permute.xlu2 %1639 }
 0x27a   : > { %v1725_v13 = vmul.f32 %v1640_v56, %v1501_v7 }
 0x281   : > { %v1600_v3 = vpop.permute.xlu2 %1599 }
 0x282   : > { %v1630_v54 = vpop.permute.xlu0 %1629  ;;  %v1550_v55 = vpop.permute.xlu1 %1549  ;;  %v1717_v20 = vmul.f32 %v1600_v3, %v1493_v15  ;;  %v1497_v3 = vld [vmem:[#allocation2 + $0x8] sm:$0xff] }
 0x283   : > { %v1723_v57 = vmul.f32 %v1630_v54, %v1499_v52  ;;  %v1707_v58 = vmul.f32 %v1550_v55, %v1483_v53  ;;  %v1488_v52 = vld [vmem:[#allocation2 + $0x68] sm:$0xff] }
 0x285   : > { %1775 = vmatmul.f32.vlgmr.msra.gmra.mxu0 %v1707_v58  ;;  %1823 = vmatmul.f32.vlgmr.msra.gmra.mxu2 %v1723_v57 }
 0x289   : > { %v1565_v14 = vpop.permute.xlu2 %1564 }
 0x28a   : > { %v1670_v62 = vpop.permute.xlu0 %1669  ;;  %v1590_v63 = vpop.permute.xlu1 %1589  ;;  %v1710_v29 = vmul.f32 %v1565_v14, %v1486_v23 }
 0x28b   : > { %v1731_v1 = vmul.f32 %v1670_v62, %v1507_v60  ;;  %v1715_v2 = vmul.f32 %v1590_v63, %v1491_v61  ;;  %v1505_v60 = vld [vmem:[#allocation2 + $0x70] sm:$0xff]  ;;  %v1513_v61 = vld [vmem:[#allocation2 + $0x20] sm:$0xff] }
 0x28d   : > { %1799 = vmatmul.f32.vlgmr.msra.gmra.mxu1 %v1715_v2  ;;  %1826 = vmatmul.f32.gmra.mxu2 %v1724_v0 }
 0x28e   : > { %1847 = vmatmul.f32.vlgmr.msra.gmra.mxu3 %v1731_v1 }
 0x291   : > { %v1690_v26 = vpop.permute.xlu2 %1689 }
 0x292   : > { %v1555_v8 = vpop.permute.xlu0 %1554  ;;  %v1595_v9 = vpop.permute.xlu1 %1594  ;;  %v1735_v40 = vmul.f32 %v1690_v26, %v1511_v34 }
 0x293   : > { %v1708_v10 = vmul.f32 %v1555_v8, %v1484_v4  ;;  %v1716_v11 = vmul.f32 %v1595_v9, %v1492_v5  ;;  %v1506_v4 = vld [vmem:[#allocation2 + $0xc0] sm:$0xff] }
 0x295   : > { %1778 = vmatmul.f32.gmra.mxu0 %v1708_v10  ;;  %1802 = vmatmul.f32.gmra.mxu1 %v1716_v11 }
 0x296   : > { %1829 = vmatmul.f32.gmra.mxu2 %v1725_v13  ;;  %1850 = vmatmul.f32.gmra.mxu3 %v1732_v12  ;;  %v1490_v12 = vld [vmem:[#allocation2 + $0x48] sm:$0xff]  ;;  %v1498_v13 = vld [vmem:[#allocation2 + $0x78] sm:$0xff] }
 0x299   : > { %v1655_v37 = vpop.permute.xlu2 %1654 }
 0x29a   : > { %v1680_v18 = vpop.permute.xlu0 %1679  ;;  %v1560_v19 = vpop.permute.xlu1 %1559  ;;  %v1728_v48 = vmul.f32 %v1655_v37, %v1504_v43 }
 0x29b   : > { %v1733_v21 = vmul.f32 %v1680_v18, %v1509_v16  ;;  %v1709_v22 = vmul.f32 %v1560_v19, %v1485_v17  ;;  %v3327_v18 = vld [vmem:[%s3447_s6] ss:$0 sm:$0xff] }
 0x29d   : > { %1781 = vmatmul.f32.gmra.mxu0 %v1709_v22  ;;  %1805 = vmatmul.f32.gmra.mxu1 %v1717_v20 }
 0x29e   : > { %1853 = vmatmul.f32.gmra.mxu3 %v1733_v21 }
 0x2a1   : > { %v1615_v49 = vpop.permute.xlu2 %1614 }
 0x2a2   : > { %v1645_v27 = vpop.permute.xlu0 %1644  ;;  %v1685_v28 = vpop.permute.xlu1 %1684  ;;  %v1720_v55 = vmul.f32 %v1615_v49, %v1496_v50 }
 0x2a3   : > { %v1726_v30 = vmul.f32 %v1645_v27, %v1502_v24  ;;  %v1734_v31 = vmul.f32 %v1685_v28, %v1510_v25 }
 0x2a5   : > { %1784 = vmatmul.f32.gmra.mxu0 %v1710_v29  ;;  %1832 = vmatmul.f32.gmra.mxu2 %v1726_v30 }
 0x2a6   : > { %1856 = vmatmul.f32.gmra.mxu3 %v1734_v31 }
 0x2a9   : > { %v1580_v58 = vpop.permute.xlu2 %1579 }
 0x2aa   : > { %v1605_v35 = vpop.permute.xlu0 %1604  ;;  %v1650_v36 = vpop.permute.xlu1 %1649  ;;  %v1713_v0 = vmul.f32 %v1580_v58, %v1489_v59 }
 0x2ab   : > { %v1718_v38 = vmul.f32 %v1605_v35, %v1494_v32  ;;  %v1727_v39 = vmul.f32 %v1650_v36, %v1503_v33 }
 0x2ad   : > { %1808 = vmatmul.f32.gmra.mxu1 %v1718_v38  ;;  %1835 = vmatmul.f32.gmra.mxu2 %v1727_v39 }
 0x2ae   : > { %1859 = vmatmul.f32.gmra.mxu3 %v1735_v40 }
 0x2b1   : > { %v1705_v5 = vpop.permute.xlu2 %1704 }
 0x2b2   : > { %v1570_v44 = vpop.permute.xlu0 %1569  ;;  %v1610_v45 = vpop.permute.xlu1 %1609  ;;  %v1738_v11 = vmul.f32 %v1705_v5, %v1514_v6 }
 0x2b3   : > { %v1711_v46 = vmul.f32 %v1570_v44, %v1487_v41  ;;  %v1719_v47 = vmul.f32 %v1610_v45, %v1495_v42 }
 0x2b5   : > { %1787 = vmatmul.f32.gmra.mxu0 %v1711_v46  ;;  %1811 = vmatmul.f32.gmra.mxu1 %v1719_v47 }
 0x2b6   : > { %1838 = vmatmul.f32.gmra.mxu2 %v1728_v48 }
 0x2ba   : > { %v1695_v53 = vpop.permute.xlu0 %1694  ;;  %v1575_v54 = vpop.permute.xlu1 %1574 }
 0x2bb   : > { %v1736_v56 = vmul.f32 %v1695_v53, %v1512_v51  ;;  %v1712_v57 = vmul.f32 %v1575_v54, %v1488_v52 }
 0x2bd   : > { %1790 = vmatmul.f32.gmra.mxu0 %v1712_v57  ;;  %1814 = vmatmul.f32.gmra.mxu1 %v1720_v55 }
 0x2be   : > { %1862 = vmatmul.f32.gmra.mxu3 %v1736_v56 }
 0x2c2   : > { %v1660_v62 = vpop.permute.xlu0 %1659  ;;  %v1700_v63 = vpop.permute.xlu1 %1699 }
 0x2c3   : > { %v1729_v1 = vmul.f32 %v1660_v62, %v1505_v60  ;;  %v1737_v2 = vmul.f32 %v1700_v63, %v1513_v61 }
 0x2c5   : > { %1793 = vmatmul.f32.gmra.mxu0 %v1713_v0  ;;  %1841 = vmatmul.f32.gmra.mxu2 %v1729_v1 }
 0x2c6   : > { %1865 = vmatmul.f32.gmra.mxu3 %v1737_v2 }
 0x2ca   : > { %v1620_v7 = vpop.permute.xlu0 %1619  ;;  %v1665_v8 = vpop.permute.xlu1 %1664 }
 0x2cb   : > { %v1721_v9 = vmul.f32 %v1620_v7, %v1497_v3  ;;  %v1730_v10 = vmul.f32 %v1665_v8, %v1506_v4 }
 0x2cd   : > { %1817 = vmatmul.f32.gmra.mxu1 %v1721_v9  ;;  %1844 = vmatmul.f32.gmra.mxu2 %v1730_v10 }
 0x2ce   : > { %1868 = vmatmul.f32.gmra.mxu3 %v1738_v11 }
 0x2d2   : > { %v1585_v14 = vpop.permute.xlu0 %1584  ;;  %v1625_v15 = vpop.permute.xlu1 %1624 }
 0x2d3   : > { %v1714_v16 = vmul.f32 %v1585_v14, %v1490_v12  ;;  %v1722_v17 = vmul.f32 %v1625_v15, %v1498_v13 }
 0x2d5   : > { %1796 = vmatmul.f32.gmra.mxu0 %v1714_v16  ;;  %1820 = vmatmul.f32.gmra.mxu1 %v1722_v17 }
 0x302   : > { %v1776_v19 = vpop.f32.mrf.mxu0 }
 0x303   : > { %v1777_v20 = vadd.f32 %v3327_v18, %v1776_v19 }
 0x305   : > { %v1872_v21 = vmax.f32 %v1777_v20, 0.0 }
 0x307   : > { %1904 = vst [vmem:[%s3075_s23] sm:$0xff] %v1872_v21 }
 0x308   : > { %v1824_v22 = vpop.f32.mrf.mxu2 }
 0x309   : > { %v1825_v23 = vadd.f32 %v3327_v18, %v1824_v22 }
 0x30a   : > { %v1800_v24 = vpop.f32.mrf.mxu1 }
 0x30b   : > { %v1888_v25 = vmax.f32 %v1825_v23, 0.0  ;;  %v1801_v26 = vadd.f32 %v3327_v18, %v1800_v24 }
 0x30d   : > { %1920 = vst [vmem:[%s3075_s23 + $0x80] sm:$0xff] %v1888_v25  ;;  %v1880_v27 = vmax.f32 %v1801_v26, 0.0 }
 0x30f   : > { %1912 = vst [vmem:[%s3075_s23 + $0x40] sm:$0xff] %v1880_v27 }
 0x310   : > { %v1827_v28 = vpop.f32.mrf.mxu2 }
 0x311   : > { %v1828_v29 = vadd.f32 %v3327_v18, %v1827_v28  ;;  %v1848_v30 = vpop.f32.mrf.mxu3 }
 0x312   : > { %v1849_v31 = vadd.f32 %v3327_v18, %v1848_v30  ;;  %v1779_v32 = vpop.f32.mrf.mxu0  ;;  %v1803_v33 = vpop.f32.mrf.mxu1 }
 0x313   : > { %v1889_v34 = vmax.f32 %v1828_v29, 0.0  ;;  %v1780_v35 = vadd.f32 %v3327_v18, %v1779_v32  ;;  %v1804_v36 = vadd.f32 %v3327_v18, %v1803_v33 }
 0x314   : > { %v1896_v37 = vmax.f32 %v1849_v31, 0.0 }
 0x315   : > { %1921 = vst [vmem:[%s3075_s23 + $0x88] sm:$0xff] %v1889_v34  ;;  %v1873_v38 = vmax.f32 %v1780_v35, 0.0  ;;  %v1881_v39 = vmax.f32 %v1804_v36, 0.0 }
 0x316   : > { %1928 = vst [vmem:[%s3075_s23 + $0xc0] sm:$0xff] %v1896_v37 }
 0x317   : > { %1905 = vst [vmem:[%s3075_s23 + $0x8] sm:$0xff] %v1873_v38 }
 0x318   : > { %1913 = vst [vmem:[%s3075_s23 + $0x48] sm:$0xff] %v1881_v39 }
 0x319   : > { %v1830_v40 = vpop.f32.mrf.mxu2  ;;  %v1851_v41 = vpop.f32.mrf.mxu3 }
 0x31a   : > { %v1831_v42 = vadd.f32 %v3327_v18, %v1830_v40  ;;  %v1852_v43 = vadd.f32 %v3327_v18, %v1851_v41  ;;  %v1782_v44 = vpop.f32.mrf.mxu0  ;;  %v1806_v45 = vpop.f32.mrf.mxu1 }
 0x31b   : > { %v1783_v46 = vadd.f32 %v3327_v18, %v1782_v44  ;;  %v1807_v47 = vadd.f32 %v3327_v18, %v1806_v45 }
 0x31c   : > { %v1890_v48 = vmax.f32 %v1831_v42, 0.0  ;;  %v1897_v49 = vmax.f32 %v1852_v43, 0.0 }
 0x31d   : > { %v1874_v50 = vmax.f32 %v1783_v46, 0.0  ;;  %v1882_v51 = vmax.f32 %v1807_v47, 0.0 }
 0x31e   : > { %1922 = vst [vmem:[%s3075_s23 + $0x90] sm:$0xff] %v1890_v48 }
 0x31f   : > { %1929 = vst [vmem:[%s3075_s23 + $0xc8] sm:$0xff] %v1897_v49 }
 0x320   : > { %1906 = vst [vmem:[%s3075_s23 + $0x10] sm:$0xff] %v1874_v50 }
 0x321   : > { %1914 = vst [vmem:[%s3075_s23 + $0x50] sm:$0xff] %v1882_v51  ;;  %v1854_v52 = vpop.f32.mrf.mxu3 }
 0x322   : > { %v1855_v53 = vadd.f32 %v3327_v18, %v1854_v52  ;;  %v1785_v54 = vpop.f32.mrf.mxu0 }
 0x323   : > { %v1786_v55 = vadd.f32 %v3327_v18, %v1785_v54 }
 0x324   : > { %v1898_v56 = vmax.f32 %v1855_v53, 0.0 }
 0x325   : > { %v1875_v57 = vmax.f32 %v1786_v55, 0.0 }
 0x326   : > { %1930 = vst [vmem:[%s3075_s23 + $0xd0] sm:$0xff] %v1898_v56 }
 0x327   : > { %1907 = vst [vmem:[%s3075_s23 + $0x18] sm:$0xff] %v1875_v57 }
 0x328   : > { %v1833_v58 = vpop.f32.mrf.mxu2 }
 0x329   : > { %v1834_v59 = vadd.f32 %v3327_v18, %v1833_v58  ;;  %v1857_v60 = vpop.f32.mrf.mxu3 }
 0x32a   : > { %v1858_v61 = vadd.f32 %v3327_v18, %v1857_v60  ;;  %v1809_v62 = vpop.f32.mrf.mxu1 }
 0x32b   : > { %v1891_v63 = vmax.f32 %v1834_v59, 0.0  ;;  %v1810_v0 = vadd.f32 %v3327_v18, %v1809_v62 }
 0x32c   : > { %v1899_v1 = vmax.f32 %v1858_v61, 0.0 }
 0x32d   : > { %1923 = vst [vmem:[%s3075_s23 + $0x98] sm:$0xff] %v1891_v63  ;;  %v1883_v2 = vmax.f32 %v1810_v0, 0.0 }
 0x32e   : > { %1931 = vst [vmem:[%s3075_s23 + $0xd8] sm:$0xff] %v1899_v1 }
 0x32f   : > { %1915 = vst [vmem:[%s3075_s23 + $0x58] sm:$0xff] %v1883_v2 }
 0x330   : > { %v1836_v3 = vpop.f32.mrf.mxu2 }
 0x331   : > { %v1837_v4 = vadd.f32 %v3327_v18, %v1836_v3  ;;  %v1860_v5 = vpop.f32.mrf.mxu3 }
 0x332   : > { %v1861_v6 = vadd.f32 %v3327_v18, %v1860_v5  ;;  %v1788_v7 = vpop.f32.mrf.mxu0  ;;  %v1812_v8 = vpop.f32.mrf.mxu1 }
 0x333   : > { %v1892_v9 = vmax.f32 %v1837_v4, 0.0  ;;  %v1789_v10 = vadd.f32 %v3327_v18, %v1788_v7  ;;  %v1813_v11 = vadd.f32 %v3327_v18, %v1812_v8 }
 0x334   : > { %v1900_v12 = vmax.f32 %v1861_v6, 0.0 }
 0x335   : > { %1924 = vst [vmem:[%s3075_s23 + $0xa0] sm:$0xff] %v1892_v9  ;;  %v1876_v13 = vmax.f32 %v1789_v10, 0.0  ;;  %v1884_v14 = vmax.f32 %v1813_v11, 0.0 }
 0x336   : > { %1932 = vst [vmem:[%s3075_s23 + $0xe0] sm:$0xff] %v1900_v12 }
 0x337   : > { %1908 = vst [vmem:[%s3075_s23 + $0x20] sm:$0xff] %v1876_v13 }
 0x338   : > { %1916 = vst [vmem:[%s3075_s23 + $0x60] sm:$0xff] %v1884_v14 }
 0x339   : > { %v1839_v15 = vpop.f32.mrf.mxu2 }
 0x33a   : > { %v1840_v16 = vadd.f32 %v3327_v18, %v1839_v15  ;;  %v1791_v17 = vpop.f32.mrf.mxu0  ;;  %v1815_v19 = vpop.f32.mrf.mxu1 }
 0x33b   : > { %v1792_v20 = vadd.f32 %v3327_v18, %v1791_v17  ;;  %v1816_v21 = vadd.f32 %v3327_v18, %v1815_v19 }
 0x33c   : > { %v1893_v22 = vmax.f32 %v1840_v16, 0.0 }
 0x33d   : > { %v1877_v23 = vmax.f32 %v1792_v20, 0.0  ;;  %v1885_v24 = vmax.f32 %v1816_v21, 0.0 }
 0x33e   : > { %1925 = vst [vmem:[%s3075_s23 + $0xa8] sm:$0xff] %v1893_v22 }
 0x33f   : > { %1909 = vst [vmem:[%s3075_s23 + $0x28] sm:$0xff] %v1877_v23 }
 0x340   : > { %1917 = vst [vmem:[%s3075_s23 + $0x68] sm:$0xff] %v1885_v24 }
 0x341   : > { %v1863_v25 = vpop.f32.mrf.mxu3 }
 0x342   : > { %v1864_v26 = vadd.f32 %v3327_v18, %v1863_v25  ;;  %v1794_v27 = vpop.f32.mrf.mxu0 }
 0x343   : > { %v1795_v28 = vadd.f32 %v3327_v18, %v1794_v27 }
 0x344   : > { %v1901_v29 = vmax.f32 %v1864_v26, 0.0 }
 0x345   : > { %v1878_v30 = vmax.f32 %v1795_v28, 0.0 }
 0x346   : > { %1933 = vst [vmem:[%s3075_s23 + $0xe8] sm:$0xff] %v1901_v29 }
 0x347   : > { %1910 = vst [vmem:[%s3075_s23 + $0x30] sm:$0xff] %v1878_v30 }
 0x348   : > { %v1842_v31 = vpop.f32.mrf.mxu2 }
 0x349   : > { %v1843_v32 = vadd.f32 %v3327_v18, %v1842_v31  ;;  %v1866_v33 = vpop.f32.mrf.mxu3 }
 0x34a   : > { %v1867_v34 = vadd.f32 %v3327_v18, %v1866_v33  ;;  %v1818_v35 = vpop.f32.mrf.mxu1 }
 0x34b   : > { %v1894_v36 = vmax.f32 %v1843_v32, 0.0  ;;  %v1819_v37 = vadd.f32 %v3327_v18, %v1818_v35 }
 0x34c   : > { %v1902_v38 = vmax.f32 %v1867_v34, 0.0 }
 0x34d   : > { %1926 = vst [vmem:[%s3075_s23 + $0xb0] sm:$0xff] %v1894_v36  ;;  %v1886_v39 = vmax.f32 %v1819_v37, 0.0 }
 0x34e   : > { %1934 = vst [vmem:[%s3075_s23 + $0xf0] sm:$0xff] %v1902_v38 }
 0x34f   : > { %1918 = vst [vmem:[%s3075_s23 + $0x70] sm:$0xff] %v1886_v39 }
 0x350   : > { %v1845_v40 = vpop.f32.mrf.mxu2 }
 0x351   : > { %v1846_v41 = vadd.f32 %v3327_v18, %v1845_v40  ;;  %v1869_v42 = vpop.f32.mrf.mxu3 }
 0x352   : > { %v1870_v43 = vadd.f32 %v3327_v18, %v1869_v42  ;;  %v1797_v44 = vpop.f32.mrf.mxu0  ;;  %v1821_v45 = vpop.f32.mrf.mxu1 }
 0x353   : > { %v1895_v46 = vmax.f32 %v1846_v41, 0.0  ;;  %v1798_v47 = vadd.f32 %v3327_v18, %v1797_v44  ;;  %v1822_v48 = vadd.f32 %v3327_v18, %v1821_v45 }
 0x354   : > { %v1903_v49 = vmax.f32 %v1870_v43, 0.0 }
 0x355   : > { %1927 = vst [vmem:[%s3075_s23 + $0xb8] sm:$0xff] %v1895_v46  ;;  %v1879_v50 = vmax.f32 %v1798_v47, 0.0  ;;  %v1887_v51 = vmax.f32 %v1822_v48, 0.0 }
 0x356   : > { %1935 = vst [vmem:[%s3075_s23 + $0xf8] sm:$0xff] %v1903_v49 }
 0x357   : > { %1911 = vst [vmem:[%s3075_s23 + $0x38] sm:$0xff] %v1879_v50 }
 0x358   : > { %1919 = vst [vmem:[%s3075_s23 + $0x78] sm:$0xff] %v1887_v51 }
 0x359   : > { %2790 = shalt.err (!%p2787_p2)
}
 0x35a   : > { %s2879_s10 = smov 128   ;;  %s2880_s23 = smov 8  }
 0x35b   : > { %2611 = dma.vmem_to_hbm [thread:$0]  (%p3001_p10), %s1950_s13, 4096, %s1952_s19, %s1937_s14, %s2879_s10, %s2879_s10, %s2880_s23  }
 0x35c PF: > { %s1966_s24 = sand.u32 1, %s2839_s9   ;;  %p2620_p5 = pnand %p2055_p13, %p3008_p1 }
 0x35d   : > { %s1967_s18 = scalar_lea.sflag [#allocation8], %s1966_s24 }
 0x35e   : > { %p2621_p6 = pneg %p2620_p5 }
 0x360   : > { %2834 = dma.done.wait (%p2621_p6), %s1967_s18, 4096  }
 0x361   : > { %2836 = vsyncadd (%p2621_p6), %s1967_s18, 4294963200  ;;  %s36_s15 = sadd.s32 1, %s2871_s15   ;;  %s3466_s30 = sld [smem:[#allocation15_spill]] }
 0x362   : > { %p33_p3 = scmp.ge.s32.totalorder %s36_s15, 4   ;;  %s3467_s10 = sld [smem:[#allocation19_spill]] }
 0x363   : > { %s3468_s29 = sld [smem:[#allocation16_spill]]  ;;  %s3472_s9 = smov %s2843_s0 }
 0x364   : > { %s3469_s12 = sld [smem:[#allocation20_spill]]  ;;  %s3474_s1 = smov %s2855_s11 }
 0x365   : > { %s3470_s13 = sld [smem:[#allocation17_spill]]  ;;  %35 = sbr.rel (!%p33_p3) target bundleno = 15 (0xf), region = 101 }
 0x366   : > { %s3471_s14 = sld [smem:[#allocation18_spill]] }
 0x367   : > { %s3473_s0 = smov %s3466_s30 }
 0x369   : > { %s3475_s11 = smov %s3468_s29 }
 0x36a   :  { %1973 = vsyncpa [#allocation7], 1 }
 0x36b   :  { %1975 = vsyncpa [#allocation7 + $0x1], 1 }
 0x36c   :  { %1976 = vsyncpa [#allocation8], 1 }
 0x36d   :  { %1978 = vsyncpa [#allocation8 + $0x1], 1 }

</bundles_post_ra>
